<compile_context>
chip_gen: v5e
topology: v5e:2x2
jax: 0.10.0
libtpu: 0.0.40
codegen_flags: <defaults>
</compile_context>

<pallas_src>
import functools

import jax
import jax.numpy as jnp
from jax.experimental import pallas as pl
from jax.experimental.pallas import tpu as pltpu

_LOG2E = 1.4426950408889634


# --------------------------------------------------------------------------
# Kernel
# --------------------------------------------------------------------------
def _flash_mqa_kernel(q_ref, k_ref, v_ref, o_ref, m_sc, l_sc, acc_sc, qs_sc,
                      *, scale, use_exp2, causal, aligned, n_q, q_tile,
                      kv_tile, j_valid, padded_j, mm_dtype):
    # q_ref: (1, tq, D) folded-head query rows; k_ref/v_ref: (1, tk, D)
    # o_ref: (1, tq, D); scratch: m/l (tq, 1) f32, acc (tq, D) f32,
    # qs (tq, D) pre-scaled q in the matmul dtype.
    q_i = pl.program_id(1)
    kv_i = pl.program_id(2)
    n_kv = pl.num_programs(2)

    expf = jnp.exp2 if use_exp2 else jnp.exp
    q_scale = scale * (_LOG2E if use_exp2 else 1.0)

    @pl.when(kv_i == 0)
    def _():
        m_sc[...] = jnp.full_like(m_sc, -jnp.inf)
        l_sc[...] = jnp.zeros_like(l_sc)
        acc_sc[...] = jnp.zeros_like(acc_sc)
        # Scale q ONCE per q tile (resident across the kv axis) instead of per
        # kv step; log2(e) is folded in so the softmax can use exp2 directly.
        qs_sc[...] = (q_ref[0] * q_scale).astype(qs_sc.dtype)

    def compute(apply_causal, apply_tail):
        k = k_ref[0]
        if k.dtype != mm_dtype:
            k = k.astype(mm_dtype)
        # Scores (already in the scaled / log2 softmax domain), MXU with f32
        # accumulation.
        s = jax.lax.dot_general(
            qs_sc[...], k, dimension_numbers=(((1,), (1,)), ((), ())),
            preferred_element_type=jnp.float32)          # (tq, tk)

        if apply_causal or apply_tail:
            jpos = kv_i * kv_tile + jax.lax.broadcasted_iota(
                jnp.int32, (1, s.shape[1]), 1)           # (1, tk)
            pred = None
            if apply_causal:
                row = jax.lax.broadcasted_iota(jnp.int32, (s.shape[0], 1), 0)
                if aligned:
                    # q tile never crosses a head boundary: positions are
                    # contiguous and derived from one scalar mod.
                    qpos = (q_i * q_tile) % n_q + row
                else:
                    qpos = (q_i * q_tile + row) % n_q
                pred = jpos > qpos
            if apply_tail:
                tail = jpos >= j_valid
                pred = tail if pred is None else jnp.logical_or(pred, tail)
            s = jnp.where(pred, -1e30, s)

        # Online softmax update (log2 domain when use_exp2).
        m_prev = m_sc[...]
        m_new = jnp.maximum(m_prev, jnp.max(s, axis=-1, keepdims=True))
        alpha = expf(m_prev - m_new)
        p = expf(s - m_new)
        l_sc[...] = alpha * l_sc[...] + jnp.sum(p, axis=-1, keepdims=True)
        v = v_ref[0]
        if v.dtype != mm_dtype:
            v = v.astype(mm_dtype)
        acc_sc[...] = alpha * acc_sc[...] + jax.lax.dot_general(
            p.astype(mm_dtype), v, dimension_numbers=(((1,), (0,)), ((), ())),
            preferred_element_type=jnp.float32)
        m_sc[...] = m_new

    last_kv = kv_i == n_kv - 1

    if causal and aligned:
        qlo = (q_i * q_tile) % n_q
        qhi = qlo + (q_tile - 1)
        klo = kv_i * kv_tile
        khi = klo + (kv_tile - 1)
        visible = klo <= qhi            # tile not entirely above the diagonal
        needs_mask = khi > qlo          # tile intersects the diagonal
        if padded_j:
            needs_mask = jnp.logical_or(needs_mask, last_kv)

        @pl.when(jnp.logical_and(visible, jnp.logical_not(needs_mask)))
        def _():
            compute(False, False)       # interior tile: no mask work at all

        @pl.when(jnp.logical_and(visible, needs_mask))
        def _():
            compute(True, padded_j)     # diagonal / padded-tail tile
    elif causal:
        # Fallback when q tiles don't align to head boundaries: mask every
        # tile (correct, no tile skipping).
        compute(True, padded_j)
    elif padded_j:
        @pl.when(jnp.logical_not(last_kv))
        def _():
            compute(False, False)

        @pl.when(last_kv)
        def _():
            compute(False, True)        # mask the padded key tail
    else:
        compute(False, False)

    @pl.when(last_kv)
    def _():
        # Normalize the PV accumulator (tq*D values) instead of p (tq*tk).
        inv_l = pl.reciprocal(l_sc[...], approx=True)   # EUP slot, ~free
        o_ref[0, :, :] = (acc_sc[...] * inv_l).astype(o_ref.dtype)


# --------------------------------------------------------------------------
# Tiling / hardware helpers
# --------------------------------------------------------------------------
def _round_up(x, m):
    return -(-x // m) * m


def _device_kind():
    try:
        return jax.devices()[0].device_kind.lower()
    except Exception:
        return ""


def _vmem_capacity_bytes():
    try:
        return int(pltpu.get_tpu_info().vmem_capacity_bytes)
    except Exception:
        return 64 * 1024 * 1024          # conservative: v7x physical VMEM


def _pick_q_tile(R, N, causal, max_tq, prefer_even_tiles):
    """Returns (tq, R_padded, aligned)."""
    if causal:
        # Aligned path: tq divides N so q tiles never cross a head boundary,
        # which enables per-q-tile causal KV-tile skipping.
        cands = [t for t in (512, 256, 128) if t <= max_tq and N % t == 0]
        if cands:
            if prefer_even_tiles:
                for t in cands:
                    if (R // t) % 2 == 0:
                        return t, R, True
            return cands[0], R, True
    if R <= max_tq:
        return R, R, False               # single full-extent q tile
    for t in (512, 256, 128):
        if t <= max_tq and R % t == 0:
            return t, R, False
    cands = [t for t in (512, 256, 128) if t <= max_tq] or [128]
    t = cands[0] if R >= 2048 else min(cands, key=lambda c: _round_up(R, c))
    return t, _round_up(R, t), False


def _pick_kv_tile(J, causal, tq):
    """Returns (tk, J_padded)."""
    if J <= 512 and not (causal and J % 128 == 0 and J > 128):
        return J, J                      # single full-extent kv tile
    cands = (512, 256, 128)
    if causal:
        # Keep kv tiles no larger than the q tile so diagonal skipping has
        # useful granularity.
        cands = tuple(t for t in cands if t <= max(tq, 128)) or (128,)
    for t in cands:
        if J % t == 0:
            return t, J
    t = cands[0] if J >= 2048 else min(cands, key=lambda c: _round_up(J, c))
    return t, _round_up(J, t)


# --------------------------------------------------------------------------
# Wrapper
# --------------------------------------------------------------------------
def attention(q, k, v, *, causal=False, mask=None, matmul_dtype=None):
    """q: (B, H, N, D); k, v: (B, J, D). Returns (B, H, N, D) in q.dtype.

    Matches the PyTorch module's forward with mask=None and dropout inactive.
    bf16 inputs are the fast MXU path; f32 callers may pass
    matmul_dtype=jnp.bfloat16 to opt into bf16 matmuls (f32 accumulation).
    """
    if mask is not None:
        # TODO(synk): optional key-padding mask (b, j) not wired in; the
        # module's forward default is mask=None, which these semantics match.
        raise NotImplementedError("key-padding mask not implemented")
    # TODO(synk): attention dropout not implemented (module default dropout=0.0).
    # TODO(synk): causal with J != N is degenerate in the reference module
    # (its (n, n) mask does not broadcast against (n, j)); here the causal
    # diagonal is anchored at key index 0, which matches the module for J == N.

    B, H, N, D = q.shape
    Bk, J, Dk = k.shape
    assert (B, D) == (Bk, Dk) and v.shape == k.shape
    scale = float(D) ** -0.5
    mm_dtype = (jnp.dtype(matmul_dtype) if matmul_dtype is not None
                else jnp.dtype(q.dtype))

    kind = _device_kind()
    is_v5e = ("v5e" in kind) or ("v5 lite" in kind) or ("v5litepod" in kind)
    dual_core = any(s in kind for s in ("v7", "v5p", "v4"))
    # v5e: single vst slot + no bf16 VPU — keep f32 score tiles smaller.
    max_tq = 256 if (is_v5e and jnp.dtype(q.dtype).itemsize >= 4) else 512

    # Fold heads into query rows (MQA shares K/V across heads): one big
    # (H*N, D) LHS keeps the MXU fed without extra K/V traffic.
    R = H * N
    tq, R_pad, aligned = _pick_q_tile(
        R, N, causal, max_tq,
        prefer_even_tiles=dual_core and (B % 2 == 1))
    tk, J_pad = _pick_kv_tile(J, causal, tq)

    q_folded = q.reshape(B, R, D)
    if R_pad != R:
        q_folded = jnp.pad(q_folded, ((0, 0), (0, R_pad - R), (0, 0)))
    k_in, v_in = k, v
    if J_pad != J:
        k_in = jnp.pad(k, ((0, 0), (0, J_pad - J), (0, 0)))
        v_in = jnp.pad(v, ((0, 0), (0, J_pad - J), (0, 0)))

    grid = (B, R_pad // tq, J_pad // tk)
    n_kv = grid[2]
    kv_buffers = 3 if (n_kv >= 3 and hasattr(pl, "Buffered")) else 2

    # VMEM budget: pipelined blocks + scratch + the live (tq, tk) f32
    # score-path temporaries, plus headroom for Mosaic internal scratch.
    itemsize = jnp.dtype(q.dtype).itemsize
    k_itemsize = jnp.dtype(k.dtype).itemsize
    block_bytes = (
        2 * tq * D * itemsize                       # q tile (double-buffered)
        + kv_buffers * 2 * tk * D * k_itemsize      # k and v tiles
        + 2 * tq * D * itemsize                     # out tile
        + tq * D * 4 + 2 * tq * 4                   # f32 acc + m + l scratch
        + tq * D * mm_dtype.itemsize                # pre-scaled q scratch
        + 4 * tq * tk * 4                           # live f32 score temporaries
    )
    physical_vmem = _vmem_capacity_bytes()
    vmem_limit = max(block_bytes + (8 << 20), 32 << 20)
    vmem_limit = int(max(min(vmem_limit, physical_vmem - (16 << 20)), 16 << 20))

    # Honest cost estimate: only claim the causal saving when tiles are really
    # skipped, and include the K/V re-read factor (one pass per q tile).
    if causal and aligned:
        computed = 0
        for qi in range(grid[1]):
            qhi = (qi * tq) % N + tq - 1
            computed += min(n_kv, qhi // tk + 1)
        pairs = computed * tq * tk
    else:
        pairs = R_pad * J_pad
    cost = pl.CostEstimate(
        flops=int(4 * B * pairs * D),
        transcendentals=int(B * pairs),
        bytes_accessed=int((q_folded.size + B * R_pad * D) * itemsize
                           + (k_in.size + v_in.size) * k_itemsize * grid[1]),
    )

    def _run(kv_bufs, use_exp2):
        kernel = functools.partial(
            _flash_mqa_kernel,
            scale=scale, use_exp2=use_exp2, causal=causal, aligned=aligned,
            n_q=N, q_tile=tq, kv_tile=tk, j_valid=J, padded_j=(J_pad != J),
            mm_dtype=mm_dtype)
        kv_kwargs = ({"pipeline_mode": pl.Buffered(kv_bufs)}
                     if kv_bufs > 2 else {})
        return pl.pallas_call(
            kernel,
            out_shape=jax.ShapeDtypeStruct((B, R_pad, D), q.dtype),
            grid_spec=pltpu.PrefetchScalarGridSpec(
                num_scalar_prefetch=0,
                grid=grid,
                in_specs=[
                    pl.BlockSpec((1, tq, D), lambda b, qi, ki: (b, qi, 0)),
                    pl.BlockSpec((1, tk, D), lambda b, qi, ki: (b, ki, 0),
                                 **kv_kwargs),
                    pl.BlockSpec((1, tk, D), lambda b, qi, ki: (b, ki, 0),
                                 **kv_kwargs),
                ],
                out_specs=pl.BlockSpec((1, tq, D), lambda b, qi, ki: (b, qi, 0)),
                scratch_shapes=[
                    pltpu.VMEM((tq, 1), jnp.float32),   # running max m
                    pltpu.VMEM((tq, 1), jnp.float32),   # running sum l
                    pltpu.VMEM((tq, D), jnp.float32),   # PV accumulator
                    pltpu.VMEM((tq, D), mm_dtype),      # pre-scaled q tile
                ],
            ),
            compiler_params=pltpu.CompilerParams(
                dimension_semantics=("parallel", "parallel", "arbitrary"),
                vmem_limit_bytes=vmem_limit,
            ),
            cost_estimate=cost,
        )(q_folded, k_in, v_in)

    # Graceful degrade: Buffered(3) K/V pipelining and exp2 are optimizations —
    # fall back if the local Pallas/Mosaic build rejects either.
    attempts = [(kv_buffers, True)]
    if kv_buffers > 2:
        attempts.append((2, True))
    attempts.append((2, False))
    out, last_err = None, None
    for kv_bufs, use_exp2 in attempts:
        try:
            out = _run(kv_bufs, use_exp2)
            break
        except Exception as err:    # pragma: no cover - conservative fallback
            last_err = err
    if out is None:
        raise last_err

    if R_pad != R:
        out = out[:, :R]
    return out.reshape(B, H, N, D)


# --------------------------------------------------------------------------
# Reference + self-test
# --------------------------------------------------------------------------
def attention_ref(q, k, v, *, causal=False):
    """Pure-JAX reference mirroring the PyTorch forward (mask=None, no dropout)."""
    scale = q.shape[-1] ** -0.5
    q32, k32, v32 = (x.astype(jnp.float32) for x in (q, k, v))
    sim = jnp.einsum('bhid,bjd->bhij', q32, k32) * scale
    if causal:
        n, j = q.shape[-2], k.shape[-2]
        cm = jnp.triu(jnp.ones((n, j), dtype=bool), 1)
        sim = jnp.where(cm, -jnp.finfo(sim.dtype).max, sim)
    attn = jax.nn.softmax(sim, axis=-1)
    return jnp.einsum('bhij,bjd->bhid', attn, v32)


if __name__ == "__main__":
    root = jax.random.PRNGKey(0)
    keys = jax.random.split(root, 4)

    def make(key, B, H, N, D, J=None, dtype=jnp.float32):
        J = N if J is None else J
        kq, kk, kv_ = jax.random.split(key, 3)
        q = jax.random.normal(kq, (B, H, N, D), dtype=jnp.float32).astype(dtype)
        k = jax.random.normal(kk, (B, J, D), dtype=jnp.float32).astype(dtype)
        v = jax.random.normal(kv_, (B, J, D), dtype=jnp.float32).astype(dtype)
        return q, k, v

    # 1) Small MQA shapes straight from the module's layout.
    q, k, v = make(keys[0], 2, 4, 8, 32)
    for causal in (False, True):
        out = jax.block_until_ready(attention(q, k, v, causal=causal))
        ref = attention_ref(q, k, v, causal=causal)
        assert out.shape == q.shape
        assert jnp.allclose(out, ref, atol=5e-3, rtol=5e-3), \
            f"mismatch causal={causal}"

    # 2) Tiled causal shape exercising aligned diagonal skipping
    #    (tq=128 divides N=384; 3 kv tiles of 128; interior tiles unmasked).
    q2, k2, v2 = make(keys[1], 1, 4, 384, 64)
    out2 = jax.block_until_ready(attention(q2, k2, v2, causal=True))
    ref2 = attention_ref(q2, k2, v2, causal=True)
    assert jnp.allclose(out2, ref2, atol=5e-3, rtol=5e-3), "mismatch tiled causal"

    # 3) bf16 inputs: the fast MXU path (no in-kernel casts).
    q3, k3, v3 = make(keys[2], 1, 4, 384, 64, dtype=jnp.bfloat16)
    out3 = jax.block_until_ready(attention(q3, k3, v3, causal=True))
    ref3 = attention_ref(q3, k3, v3, causal=True)
    assert jnp.allclose(out3.astype(jnp.float32), ref3, atol=5e-2, rtol=5e-2), \
        "mismatch bf16"

    # 4) Non-causal shape where both R and J are padded to tile multiples
    #    (exercises the in-kernel key-tail masking and q-row padding).
    q4, k4, v4 = make(keys[3], 2, 4, 150, 64, J=600)
    out4 = jax.block_until_ready(attention(q4, k4, v4, causal=False))
    ref4 = attention_ref(q4, k4, v4, causal=False)
    assert jnp.allclose(out4, ref4, atol=5e-3, rtol=5e-3), \
        "mismatch padded non-causal"

    print("KERNEL_OK")
</pallas_src>

<mosaic_0001>
module attributes {stable_mosaic.version = 11 : i64} {
  func.func @_flash_mqa_kernel(%arg0: i32, %arg1: i32, %arg2: i32, %arg3: memref<1x32x32xf32, #tpu.memory_space<vmem>>, %arg4: memref<1x8x32xf32, #tpu.memory_space<vmem>>, %arg5: memref<1x8x32xf32, #tpu.memory_space<vmem>>, %arg6: memref<1x32x32xf32, #tpu.memory_space<vmem>>, %arg7: memref<32x1xf32, #tpu.memory_space<vmem>>, %arg8: memref<32x1xf32, #tpu.memory_space<vmem>>, %arg9: memref<32x32xf32, #tpu.memory_space<vmem>>, %arg10: memref<32x32xf32, #tpu.memory_space<vmem>>) attributes {dimension_semantics = [#tpu.dimension_semantics<parallel>, #tpu.dimension_semantics<parallel>, #tpu.dimension_semantics<arbitrary>], iteration_bounds = array<i64: 2, 1, 1>, scalar_prefetch = 0 : i64, scratch_operands = 4 : i64, tpu.core_type = #tpu.core_type<tc>, window_params = [{transform_indices = @transform_0, window_bounds = array<i64: 1, 32, 32>}, {transform_indices = @transform_1, window_bounds = array<i64: 1, 8, 32>}, {transform_indices = @transform_2, window_bounds = array<i64: 1, 8, 32>}, {transform_indices = @transform_3, window_bounds = array<i64: 1, 32, 32>}]} {
    %c0_i32 = arith.constant 0 : i32
    %0 = arith.cmpi eq, %arg2, %c0_i32 : i32
    %1 = arith.extui %0 : i1 to i32
    %c0_i32_0 = arith.constant 0 : i32
    %2 = arith.cmpi ne, %1, %c0_i32_0 : i32
    scf.if %2 {
      %cst_25 = arith.constant 0xFF800000 : f32
      %34 = vector.broadcast %cst_25 : f32 to vector<32x1xf32>
      %c0_26 = arith.constant 0 : index
      %c0_27 = arith.constant 0 : index
      %35 = vector.load %arg7[%c0_26, %c0_27] : memref<32x1xf32, #tpu.memory_space<vmem>>, vector<32x1xf32>
      tpu.vector_store %arg7[%c0_26, %c0_27], %34 {strides = array<i32>} : memref<32x1xf32, #tpu.memory_space<vmem>>, vector<32x1xf32>,
      %cst_28 = arith.constant 0.000000e+00 : f32
      %36 = vector.broadcast %cst_28 : f32 to vector<32x1xf32>
      %c0_29 = arith.constant 0 : index
      %c0_30 = arith.constant 0 : index
      %37 = vector.load %arg8[%c0_29, %c0_30] : memref<32x1xf32, #tpu.memory_space<vmem>>, vector<32x1xf32>
      tpu.vector_store %arg8[%c0_29, %c0_30], %36 {strides = array<i32>} : memref<32x1xf32, #tpu.memory_space<vmem>>, vector<32x1xf32>,
      %cst_31 = arith.constant 0.000000e+00 : f32
      %38 = vector.broadcast %cst_31 : f32 to vector<32x32xf32>
      %c0_32 = arith.constant 0 : index
      %c0_33 = arith.constant 0 : index
      %39 = vector.load %arg9[%c0_32, %c0_33] : memref<32x32xf32, #tpu.memory_space<vmem>>, vector<32x32xf32>
      tpu.vector_store %arg9[%c0_32, %c0_33], %38 {strides = array<i32>} : memref<32x32xf32, #tpu.memory_space<vmem>>, vector<32x32xf32>,
      %c0_34 = arith.constant 0 : index
      %c0_35 = arith.constant 0 : index
      %c0_36 = arith.constant 0 : index
      %40 = vector.load %arg3[%c0_34, %c0_35, %c0_36] : memref<1x32x32xf32, #tpu.memory_space<vmem>>, vector<1x32x32xf32>
      %41 = vector.shape_cast %40 : vector<1x32x32xf32> to vector<32x32xf32>
      %cst_37 = arith.constant 0.255034864 : f32
      %42 = vector.broadcast %cst_37 : f32 to vector<32x32xf32>
      %43 = arith.mulf %41, %42 : vector<32x32xf32>
      %c0_38 = arith.constant 0 : index
      %c0_39 = arith.constant 0 : index
      %44 = vector.load %arg10[%c0_38, %c0_39] : memref<32x32xf32, #tpu.memory_space<vmem>>, vector<32x32xf32>
      tpu.vector_store %arg10[%c0_38, %c0_39], %43 {strides = array<i32>} : memref<32x32xf32, #tpu.memory_space<vmem>>, vector<32x32xf32>,
    } else {
    }
    %c0_i32_1 = arith.constant 0 : i32
    %3 = arith.cmpi eq, %arg2, %c0_i32_1 : i32
    %c0 = arith.constant 0 : index
    %c0_2 = arith.constant 0 : index
    %c0_3 = arith.constant 0 : index
    %4 = vector.load %arg4[%c0, %c0_2, %c0_3] : memref<1x8x32xf32, #tpu.memory_space<vmem>>, vector<1x8x32xf32>
    %5 = vector.shape_cast %4 : vector<1x8x32xf32> to vector<8x32xf32>
    %c0_4 = arith.constant 0 : index
    %c0_5 = arith.constant 0 : index
    %6 = vector.load %arg10[%c0_4, %c0_5] : memref<32x32xf32, #tpu.memory_space<vmem>>, vector<32x32xf32>
    %cst = arith.constant dense<0.000000e+00> : vector<32x8xf32>
    %7 = tpu.matmul %6, %5, %cst {dimension_numbers = #tpu.dot_dimension_numbers<[1], [1], [0], [0], [0, 0, 1, 0], [], []>} : vector<32x32xf32>, vector<8x32xf32>, vector<32x8xf32> -> vector<32x8xf32>
    %c0_6 = arith.constant 0 : index
    %c0_7 = arith.constant 0 : index
    %8 = vector.load %arg7[%c0_6, %c0_7] : memref<32x1xf32, #tpu.memory_space<vmem>>, vector<32x1xf32>
    %cst_8 = arith.constant dense<0xFF800000> : vector<32xf32>
    %9 = vector.multi_reduction <maximumf>, %7, %cst_8 [1] : vector<32x8xf32> to vector<32xf32>
    %10 = vector.shape_cast %9 : vector<32xf32> to vector<32x1xf32>
    %11 = arith.maximumf %8, %10 : vector<32x1xf32>
    %12 = arith.subf %8, %11 : vector<32x1xf32>
    %13 = math.exp2 %12 : vector<32x1xf32>
    %14 = vector.broadcast %11 : vector<32x1xf32> to vector<32x8xf32>
    %15 = arith.subf %7, %14 : vector<32x8xf32>
    %16 = math.exp2 %15 : vector<32x8xf32>
    %c0_9 = arith.constant 0 : index
    %c0_10 = arith.constant 0 : index
    %17 = vector.load %arg8[%c0_9, %c0_10] : memref<32x1xf32, #tpu.memory_space<vmem>>, vector<32x1xf32>
    %18 = arith.mulf %13, %17 : vector<32x1xf32>
    %cst_11 = arith.constant dense<0.000000e+00> : vector<32xf32>
    %19 = vector.multi_reduction <add>, %16, %cst_11 [1] : vector<32x8xf32> to vector<32xf32>
    %20 = vector.shape_cast %19 : vector<32xf32> to vector<32x1xf32>
    %21 = arith.addf %18, %20 : vector<32x1xf32>
    %c0_12 = arith.constant 0 : index
    %c0_13 = arith.constant 0 : index
    %22 = vector.load %arg8[%c0_12, %c0_13] : memref<32x1xf32, #tpu.memory_space<vmem>>, vector<32x1xf32>
    tpu.vector_store %arg8[%c0_12, %c0_13], %21 {strides = array<i32>} : memref<32x1xf32, #tpu.memory_space<vmem>>, vector<32x1xf32>,
    %c0_14 = arith.constant 0 : index
    %c0_15 = arith.constant 0 : index
    %c0_16 = arith.constant 0 : index
    %23 = vector.load %arg5[%c0_14, %c0_15, %c0_16] : memref<1x8x32xf32, #tpu.memory_space<vmem>>, vector<1x8x32xf32>
    %24 = vector.shape_cast %23 : vector<1x8x32xf32> to vector<8x32xf32>
    %c0_17 = arith.constant 0 : index
    %c0_18 = arith.constant 0 : index
    %25 = vector.load %arg9[%c0_17, %c0_18] : memref<32x32xf32, #tpu.memory_space<vmem>>, vector<32x32xf32>
    %26 = vector.broadcast %13 : vector<32x1xf32> to vector<32x32xf32>
    %27 = arith.mulf %26, %25 : vector<32x32xf32>
    %cst_19 = arith.constant dense<0.000000e+00> : vector<32x32xf32>
    %28 = tpu.matmul %16, %24, %cst_19 {dimension_numbers = #tpu.dot_dimension_numbers<[1], [0], [0], [1], [0, 0, 1, 1], [], []>} : vector<32x8xf32>, vector<8x32xf32>, vector<32x32xf32> -> vector<32x32xf32>
    %29 = arith.addf %27, %28 : vector<32x32xf32>
    %c0_20 = arith.constant 0 : index
    %c0_21 = arith.constant 0 : index
    %30 = vector.load %arg9[%c0_20, %c0_21] : memref<32x32xf32, #tpu.memory_space<vmem>>, vector<32x32xf32>
    tpu.vector_store %arg9[%c0_20, %c0_21], %29 {strides = array<i32>} : memref<32x32xf32, #tpu.memory_space<vmem>>, vector<32x32xf32>,
    %c0_22 = arith.constant 0 : index
    %c0_23 = arith.constant 0 : index
    %31 = vector.load %arg7[%c0_22, %c0_23] : memref<32x1xf32, #tpu.memory_space<vmem>>, vector<32x1xf32>
    tpu.vector_store %arg7[%c0_22, %c0_23], %11 {strides = array<i32>} : memref<32x1xf32, #tpu.memory_space<vmem>>, vector<32x1xf32>,
    %32 = arith.extui %3 : i1 to i32
    %c0_i32_24 = arith.constant 0 : i32
    %33 = arith.cmpi ne, %32, %c0_i32_24 : i32
    scf.if %33 {
      %c0_25 = arith.constant 0 : index
      %c0_26 = arith.constant 0 : index
      %34 = vector.load %arg8[%c0_25, %c0_26] : memref<32x1xf32, #tpu.memory_space<vmem>>, vector<32x1xf32>
      %35 = tpu.reciprocal %34 {approx = true} : vector<32x1xf32> -> vector<32x1xf32>
      %c0_27 = arith.constant 0 : index
      %c0_28 = arith.constant 0 : index
      %36 = vector.load %arg9[%c0_27, %c0_28] : memref<32x32xf32, #tpu.memory_space<vmem>>, vector<32x32xf32>
      %37 = vector.broadcast %35 : vector<32x1xf32> to vector<32x32xf32>
      %38 = arith.mulf %36, %37 : vector<32x32xf32>
      %c0_29 = arith.constant 0 : index
      %c0_30 = arith.constant 0 : index
      %c0_31 = arith.constant 0 : index
      %39 = vector.load %arg6[%c0_29, %c0_30, %c0_31] : memref<1x32x32xf32, #tpu.memory_space<vmem>>, vector<1x32x32xf32>
      %40 = vector.shape_cast %39 : vector<1x32x32xf32> to vector<32x32xf32>
      %41 = vector.shape_cast %38 : vector<32x32xf32> to vector<1x32x32xf32>
      tpu.vector_store %arg6[%c0_29, %c0_30, %c0_31], %41 {strides = array<i32>} : memref<1x32x32xf32, #tpu.memory_space<vmem>>, vector<1x32x32xf32>,
    } else {
    }
    return
  }
  func.func @transform_0(%arg0: i32, %arg1: i32, %arg2: i32) -> (i32, i32, i32) {
    %c0_i32 = arith.constant 0 : i32
    %c0_i32_0 = arith.constant 0 : i32
    return %arg0, %arg1, %c0_i32 : i32, i32, i32
  }
  func.func @transform_1(%arg0: i32, %arg1: i32, %arg2: i32) -> (i32, i32, i32) {
    %c0_i32 = arith.constant 0 : i32
    %c0_i32_0 = arith.constant 0 : i32
    return %arg0, %arg2, %c0_i32 : i32, i32, i32
  }
  func.func @transform_2(%arg0: i32, %arg1: i32, %arg2: i32) -> (i32, i32, i32) {
    %c0_i32 = arith.constant 0 : i32
    %c0_i32_0 = arith.constant 0 : i32
    return %arg0, %arg2, %c0_i32 : i32, i32, i32
  }
  func.func @transform_3(%arg0: i32, %arg1: i32, %arg2: i32) -> (i32, i32, i32) {
    %c0_i32 = arith.constant 0 : i32
    %c0_i32_0 = arith.constant 0 : i32
    return %arg0, %arg1, %c0_i32 : i32, i32, i32
  }
}

module attributes {stable_mosaic.version = 11 : i64} {
  func.func @_flash_mqa_kernel(%arg0: i32, %arg1: i32, %arg2: i32, %arg3: memref<1x32x32xf32, #tpu.memory_space<vmem>>, %arg4: memref<1x8x32xf32, #tpu.memory_space<vmem>>, %arg5: memref<1x8x32xf32, #tpu.memory_space<vmem>>, %arg6: memref<1x32x32xf32, #tpu.memory_space<vmem>>, %arg7: memref<32x1xf32, #tpu.memory_space<vmem>>, %arg8: memref<32x1xf32, #tpu.memory_space<vmem>>, %arg9: memref<32x32xf32, #tpu.memory_space<vmem>>, %arg10: memref<32x32xf32, #tpu.memory_space<vmem>>) attributes {dimension_semantics = [#tpu.dimension_semantics<parallel>, #tpu.dimension_semantics<parallel>, #tpu.dimension_semantics<arbitrary>], iteration_bounds = array<i64: 2, 1, 1>, scalar_prefetch = 0 : i64, scratch_operands = 4 : i64, tpu.core_type = #tpu.core_type<tc>, window_params = [{transform_indices = @transform_0, window_bounds = array<i64: 1, 32, 32>}, {transform_indices = @transform_1, window_bounds = array<i64: 1, 8, 32>}, {transform_indices = @transform_2, window_bounds = array<i64: 1, 8, 32>}, {transform_indices = @transform_3, window_bounds = array<i64: 1, 32, 32>}]} {
    %c0_i32 = arith.constant 0 : i32
    %0 = arith.cmpi eq, %arg2, %c0_i32 : i32
    %1 = arith.extui %0 : i1 to i32
    %c0_i32_0 = arith.constant 0 : i32
    %2 = arith.cmpi ne, %1, %c0_i32_0 : i32
    scf.if %2 {
      %cst_25 = arith.constant 0xFF800000 : f32
      %34 = vector.broadcast %cst_25 : f32 to vector<32x1xf32>
      %c0_26 = arith.constant 0 : index
      %c0_27 = arith.constant 0 : index
      %35 = vector.load %arg7[%c0_26, %c0_27] : memref<32x1xf32, #tpu.memory_space<vmem>>, vector<32x1xf32>
      tpu.vector_store %arg7[%c0_26, %c0_27], %34 {strides = array<i32>} : memref<32x1xf32, #tpu.memory_space<vmem>>, vector<32x1xf32>,
      %cst_28 = arith.constant 0.000000e+00 : f32
      %36 = vector.broadcast %cst_28 : f32 to vector<32x1xf32>
      %c0_29 = arith.constant 0 : index
      %c0_30 = arith.constant 0 : index
      %37 = vector.load %arg8[%c0_29, %c0_30] : memref<32x1xf32, #tpu.memory_space<vmem>>, vector<32x1xf32>
      tpu.vector_store %arg8[%c0_29, %c0_30], %36 {strides = array<i32>} : memref<32x1xf32, #tpu.memory_space<vmem>>, vector<32x1xf32>,
      %cst_31 = arith.constant 0.000000e+00 : f32
      %38 = vector.broadcast %cst_31 : f32 to vector<32x32xf32>
      %c0_32 = arith.constant 0 : index
      %c0_33 = arith.constant 0 : index
      %39 = vector.load %arg9[%c0_32, %c0_33] : memref<32x32xf32, #tpu.memory_space<vmem>>, vector<32x32xf32>
      tpu.vector_store %arg9[%c0_32, %c0_33], %38 {strides = array<i32>} : memref<32x32xf32, #tpu.memory_space<vmem>>, vector<32x32xf32>,
      %c0_34 = arith.constant 0 : index
      %c0_35 = arith.constant 0 : index
      %c0_36 = arith.constant 0 : index
      %40 = vector.load %arg3[%c0_34, %c0_35, %c0_36] : memref<1x32x32xf32, #tpu.memory_space<vmem>>, vector<1x32x32xf32>
      %41 = vector.shape_cast %40 : vector<1x32x32xf32> to vector<32x32xf32>
      %cst_37 = arith.constant 0.176776692 : f32
      %42 = vector.broadcast %cst_37 : f32 to vector<32x32xf32>
      %43 = arith.mulf %41, %42 : vector<32x32xf32>
      %c0_38 = arith.constant 0 : index
      %c0_39 = arith.constant 0 : index
      %44 = vector.load %arg10[%c0_38, %c0_39] : memref<32x32xf32, #tpu.memory_space<vmem>>, vector<32x32xf32>
      tpu.vector_store %arg10[%c0_38, %c0_39], %43 {strides = array<i32>} : memref<32x32xf32, #tpu.memory_space<vmem>>, vector<32x32xf32>,
    } else {
    }
    %c0_i32_1 = arith.constant 0 : i32
    %3 = arith.cmpi eq, %arg2, %c0_i32_1 : i32
    %c0 = arith.constant 0 : index
    %c0_2 = arith.constant 0 : index
    %c0_3 = arith.constant 0 : index
    %4 = vector.load %arg4[%c0, %c0_2, %c0_3] : memref<1x8x32xf32, #tpu.memory_space<vmem>>, vector<1x8x32xf32>
    %5 = vector.shape_cast %4 : vector<1x8x32xf32> to vector<8x32xf32>
    %c0_4 = arith.constant 0 : index
    %c0_5 = arith.constant 0 : index
    %6 = vector.load %arg10[%c0_4, %c0_5] : memref<32x32xf32, #tpu.memory_space<vmem>>, vector<32x32xf32>
    %cst = arith.constant dense<0.000000e+00> : vector<32x8xf32>
    %7 = tpu.matmul %6, %5, %cst {dimension_numbers = #tpu.dot_dimension_numbers<[1], [1], [0], [0], [0, 0, 1, 0], [], []>} : vector<32x32xf32>, vector<8x32xf32>, vector<32x8xf32> -> vector<32x8xf32>
    %c0_6 = arith.constant 0 : index
    %c0_7 = arith.constant 0 : index
    %8 = vector.load %arg7[%c0_6, %c0_7] : memref<32x1xf32, #tpu.memory_space<vmem>>, vector<32x1xf32>
    %cst_8 = arith.constant dense<0xFF800000> : vector<32xf32>
    %9 = vector.multi_reduction <maximumf>, %7, %cst_8 [1] : vector<32x8xf32> to vector<32xf32>
    %10 = vector.shape_cast %9 : vector<32xf32> to vector<32x1xf32>
    %11 = arith.maximumf %8, %10 : vector<32x1xf32>
    %12 = arith.subf %8, %11 : vector<32x1xf32>
    %13 = math.exp %12 : vector<32x1xf32>
    %14 = vector.broadcast %11 : vector<32x1xf32> to vector<32x8xf32>
    %15 = arith.subf %7, %14 : vector<32x8xf32>
    %16 = math.exp %15 : vector<32x8xf32>
    %c0_9 = arith.constant 0 : index
    %c0_10 = arith.constant 0 : index
    %17 = vector.load %arg8[%c0_9, %c0_10] : memref<32x1xf32, #tpu.memory_space<vmem>>, vector<32x1xf32>
    %18 = arith.mulf %13, %17 : vector<32x1xf32>
    %cst_11 = arith.constant dense<0.000000e+00> : vector<32xf32>
    %19 = vector.multi_reduction <add>, %16, %cst_11 [1] : vector<32x8xf32> to vector<32xf32>
    %20 = vector.shape_cast %19 : vector<32xf32> to vector<32x1xf32>
    %21 = arith.addf %18, %20 : vector<32x1xf32>
    %c0_12 = arith.constant 0 : index
    %c0_13 = arith.constant 0 : index
    %22 = vector.load %arg8[%c0_12, %c0_13] : memref<32x1xf32, #tpu.memory_space<vmem>>, vector<32x1xf32>
    tpu.vector_store %arg8[%c0_12, %c0_13], %21 {strides = array<i32>} : memref<32x1xf32, #tpu.memory_space<vmem>>, vector<32x1xf32>,
    %c0_14 = arith.constant 0 : index
    %c0_15 = arith.constant 0 : index
    %c0_16 = arith.constant 0 : index
    %23 = vector.load %arg5[%c0_14, %c0_15, %c0_16] : memref<1x8x32xf32, #tpu.memory_space<vmem>>, vector<1x8x32xf32>
    %24 = vector.shape_cast %23 : vector<1x8x32xf32> to vector<8x32xf32>
    %c0_17 = arith.constant 0 : index
    %c0_18 = arith.constant 0 : index
    %25 = vector.load %arg9[%c0_17, %c0_18] : memref<32x32xf32, #tpu.memory_space<vmem>>, vector<32x32xf32>
    %26 = vector.broadcast %13 : vector<32x1xf32> to vector<32x32xf32>
    %27 = arith.mulf %26, %25 : vector<32x32xf32>
    %cst_19 = arith.constant dense<0.000000e+00> : vector<32x32xf32>
    %28 = tpu.matmul %16, %24, %cst_19 {dimension_numbers = #tpu.dot_dimension_numbers<[1], [0], [0], [1], [0, 0, 1, 1], [], []>} : vector<32x8xf32>, vector<8x32xf32>, vector<32x32xf32> -> vector<32x32xf32>
    %29 = arith.addf %27, %28 : vector<32x32xf32>
    %c0_20 = arith.constant 0 : index
    %c0_21 = arith.constant 0 : index
    %30 = vector.load %arg9[%c0_20, %c0_21] : memref<32x32xf32, #tpu.memory_space<vmem>>, vector<32x32xf32>
    tpu.vector_store %arg9[%c0_20, %c0_21], %29 {strides = array<i32>} : memref<32x32xf32, #tpu.memory_space<vmem>>, vector<32x32xf32>,
    %c0_22 = arith.constant 0 : index
    %c0_23 = arith.constant 0 : index
    %31 = vector.load %arg7[%c0_22, %c0_23] : memref<32x1xf32, #tpu.memory_space<vmem>>, vector<32x1xf32>
    tpu.vector_store %arg7[%c0_22, %c0_23], %11 {strides = array<i32>} : memref<32x1xf32, #tpu.memory_space<vmem>>, vector<32x1xf32>,
    %32 = arith.extui %3 : i1 to i32
    %c0_i32_24 = arith.constant 0 : i32
    %33 = arith.cmpi ne, %32, %c0_i32_24 : i32
    scf.if %33 {
      %c0_25 = arith.constant 0 : index
      %c0_26 = arith.constant 0 : index
      %34 = vector.load %arg8[%c0_25, %c0_26] : memref<32x1xf32, #tpu.memory_space<vmem>>, vector<32x1xf32>
      %35 = tpu.reciprocal %34 {approx = true} : vector<32x1xf32> -> vector<32x1xf32>
      %c0_27 = arith.constant 0 : index
      %c0_28 = arith.constant 0 : index
      %36 = vector.load %arg9[%c0_27, %c0_28] : memref<32x32xf32, #tpu.memory_space<vmem>>, vector<32x32xf32>
      %37 = vector.broadcast %35 : vector<32x1xf32> to vector<32x32xf32>
      %38 = arith.mulf %36, %37 : vector<32x32xf32>
      %c0_29 = arith.constant 0 : index
      %c0_30 = arith.constant 0 : index
      %c0_31 = arith.constant 0 : index
      %39 = vector.load %arg6[%c0_29, %c0_30, %c0_31] : memref<1x32x32xf32, #tpu.memory_space<vmem>>, vector<1x32x32xf32>
      %40 = vector.shape_cast %39 : vector<1x32x32xf32> to vector<32x32xf32>
      %41 = vector.shape_cast %38 : vector<32x32xf32> to vector<1x32x32xf32>
      tpu.vector_store %arg6[%c0_29, %c0_30, %c0_31], %41 {strides = array<i32>} : memref<1x32x32xf32, #tpu.memory_space<vmem>>, vector<1x32x32xf32>,
    } else {
    }
    return
  }
  func.func @transform_0(%arg0: i32, %arg1: i32, %arg2: i32) -> (i32, i32, i32) {
    %c0_i32 = arith.constant 0 : i32
    %c0_i32_0 = arith.constant 0 : i32
    return %arg0, %arg1, %c0_i32 : i32, i32, i32
  }
  func.func @transform_1(%arg0: i32, %arg1: i32, %arg2: i32) -> (i32, i32, i32) {
    %c0_i32 = arith.constant 0 : i32
    %c0_i32_0 = arith.constant 0 : i32
    return %arg0, %arg2, %c0_i32 : i32, i32, i32
  }
  func.func @transform_2(%arg0: i32, %arg1: i32, %arg2: i32) -> (i32, i32, i32) {
    %c0_i32 = arith.constant 0 : i32
    %c0_i32_0 = arith.constant 0 : i32
    return %arg0, %arg2, %c0_i32 : i32, i32, i32
  }
  func.func @transform_3(%arg0: i32, %arg1: i32, %arg2: i32) -> (i32, i32, i32) {
    %c0_i32 = arith.constant 0 : i32
    %c0_i32_0 = arith.constant 0 : i32
    return %arg0, %arg1, %c0_i32 : i32, i32, i32
  }
}

</mosaic_0001>

<bundles_post_ra>
// kernel: tpu_custom_call.1
= control target key start
LH: loop header
LB: loop body
LE: loop exit
PB: predicated region body
PF: predicated region fallthrough
CT: control target
= control target key end

     0   :  { %s1329_s0 = inlined_call_operand.hbm [shape: f32[2,32,32], index: 0, kind: input, shape index: {}]   ;;  %s1330_s1 = inlined_call_operand.hbm [shape: f32[2,8,32], index: 1, kind: input, shape index: {}]   ;;  %s1331_s2 = inlined_call_operand.hbm [shape: f32[2,8,32], index: 2, kind: input, shape index: {}]   ;;  %s1332_s3 = inlined_call_operand.hbm [shape: f32[2,32,32], index: 3, kind: output, shape index: {}]  }
   0x1   :  { %1336 = sst [smem:[#allocation19_spill]] %s1330_s1 }
   0x2   :  { %1337 = sst [smem:[#allocation20_spill]] %s1331_s2 }
   0x3   :  { %8 = vsyncpa [#allocation7], 0 }
   0x4   :  { %10 = vsyncpa [#allocation7 + $0x1], 0 }
   0x5   :  { %11 = vsyncpa [#allocation10], 0 }
   0x6   :  { %13 = vsyncpa [#allocation10 + $0x1], 0 }
   0x7   :  { %14 = vsyncpa [#allocation8], 0 }
   0x8   :  { %16 = vsyncpa [#allocation8 + $0x1], 0  ;;  %s1088_s12 = smov 0   ;;  %s1090_s13 = smov 0  }
   0x9   :  { %s1092_s14 = smov 0   ;;  %s1094_s15 = smov 0  }
   0xa   :  { %s1096_s16 = smov 0   ;;  %s1098_s17 = smov 0  }
   0xb LB: > { %1338 = sst [smem:[#allocation16_spill]] %s1047_s14  ;;  %s1119_s18 = sadd.s32 4294967295, %s1059_s17   ;;  %s1059_s17 = sphi %s1098_s17, %s22_s17   ;;  %s1055_s16 = sphi %s1096_s16, %s1357_s16   ;;  %s1051_s15 = sphi %s1094_s15, %s1356_s15   ;;  %s1047_s14 = sphi %s1092_s14, %s1355_s14   ;;  %s1043_s13 = sphi %s1090_s13, %s1354_s13   ;;  %s1039_s12 = sphi %s1088_s12, %s1353_s12  }
   0xc   : > { %s744_s19 = sadd.s32 4294967294, %s1059_s17   ;;  %s41_s20 = sadd.s32 1, %s1055_s16 }
   0xd   : > { %s50_s21 = sadd.s32 1, %s1047_s14  ;;  %p43_p0 = scmp.ge.s32.totalorder %s41_s20, 2 }
   0xe   : > { %p57_p1 = scmp.ne.s32.totalorder %s1047_s14, %s1043_s13  ;;  %p58_p2 = scmp.eq.s32.totalorder %s1059_s17, 0 }
   0xf   : > { %p63_p3 = scmp.ne.s32.totalorder %s1043_s13, %s1039_s12  ;;  %s1359_s20 = smov (%p43_p0, %s41_s20), 0 }
  0x10   : > { %1339 = sst [smem:[#allocation17_spill]] %s1359_s20  ;;  %p1131_p4 = por %p58_p2, %p57_p1 }
  0x11   : > { %p64_p5 = scmp.eq.s32.totalorder %s1119_s18, 0  ;;  %s45_s23 = ssub.s32 %s1055_s16, %s1359_s20 }
  0x12   : > { %p145_p6 = scmp.eq.s32.totalorder %s1119_s18, 1  ;;  %p48_p7 = scmp.eq.s32.totalorder %s45_s23, 0 }
  0x13   : > { %p1139_p8 = por %p64_p5, %p63_p3  ;;  %p151_p10 = scmp.eq.s32.totalorder %s744_s19, 1 }
  0x14   : > { %p1143_p9 = por %p145_p6, %p57_p1  ;;  %p746_p12 = scmp.ge.s32.totalorder %s1059_s17, 2 }
  0x15   : > { %s1148_s26 = scalar_select %p48_p7, %s1047_s14, %s50_s21  }
  0x16   : > { %p1150_p11 = por %p151_p10, %p63_p3  ;;  %p799_p13 = scmp.lt.s32.totalorder %s1059_s17, 2 }
  0x17   : > { %1343 = sst [smem:[#allocation18_spill]] %s1148_s26  ;;  %s1157_s28 = sand.u32 1, %s1047_s14  }
  0x18   : > { %s195_s29 = sand.u32 1, %s1059_s17   ;;  %s1333_s30 = sshll.u32 %s1157_s28, 3 }
  0x19   : > { %p1163_p0 = pnand %p799_p13, %p1131_p4  ;;  %s751_s5 = sshll.u32 %s1055_s16, 3 }
  0x1a   : > { %s1346_s1 = sld [smem:[#allocation19_spill]]  ;;  %s199_s10 = scalar_lea.vmem [#allocation9], %s1333_s30 }
  0x1b   : > { %s208_s11 = sshll.u32 %s199_s10, 4  ;;  %s196_s19 = scalar_lea.sflag [#allocation10], %s195_s29  ;;  %s209_s11 = int_to_ptr.vmem [resolvable:$true] %s208_s11 }
  0x1c   : > { %s1347_s2 = sld [smem:[#allocation20_spill]]  ;;  %p754_p1 = scmp.ge.s32.totalorder %s1059_s17, 1 }
  0x1d   : > { %p233_p2 = scmp.lt.s32.totalorder %s1059_s17, 3  ;;  %s747_s7 = sshll.u32 %s1157_s28, 5 }
  0x1e   : > { %s1061_s21 = smov 128   ;;  %s1062_s22 = smov 8  }
  0x1f   : > { %p1180_p3 = pnand %p754_p1, %p233_p2  ;;  %s1349_s20 = sshll.u32 %s1157_s28, 3 }
  0x20   : > { %s204_s8 = scalar_lea.hbm %s1346_s1, %s751_s5  ;;  %s219_s26 = scalar_lea.vmem [#allocation11], %s1349_s20 }
  0x21   : > { %s206_s9 = sshll.u32 %s204_s8, 4  ;;  %s773_s8 = sshll.u32 %s1055_s16, 5  ;;  %s207_s9 = int_to_ptr.hbm [resolvable:$true] %s206_s9 }
  0x22   : > { %791 = dma.hbm_to_vmem [thread:$0]  (!%p1163_p0), %s207_s9, 128, %s209_s11, %s196_s19  }
  0x23   : > { %s224_s23 = scalar_lea.hbm %s1347_s2, %s751_s5  ;;  %s182_s29 = scalar_lea.hbm %s1329_s0, %s773_s8 }
  0x24   : > { %s183_s9 = sshll.u32 %s182_s29, 4  ;;  %s175_s11 = scalar_lea.vmem [#allocation6], %s747_s7  ;;  %s184_s9 = int_to_ptr.hbm [resolvable:$true] %s183_s9 }
  0x25   : > { %s185_s1 = sshll.u32 %s175_s11, 4  ;;  %s172_s5 = scalar_lea.sflag [#allocation7], %s1157_s28  ;;  %s186_s1 = int_to_ptr.vmem [resolvable:$true] %s185_s1 }
  0x26   : > { %788 = dma.hbm_to_vmem [thread:$0]  (!%p1163_p0), %s184_s9, 512, %s186_s1, %s172_s5, %s1061_s21, %s1061_s21, %s1062_s22  }
  0x27   : > { %s226_s2 = sshll.u32 %s224_s23, 4  ;;  %s228_s14 = sshll.u32 %s219_s26, 4  ;;  %s227_s2 = int_to_ptr.hbm [resolvable:$true] %s226_s2  ;;  %s229_s14 = int_to_ptr.vmem [resolvable:$true] %s228_s14 }
  0x28   : > { %794 = dma.hbm_to_vmem [thread:$0]  (!%p1163_p0), %s227_s2, 128, %s229_s14, %s196_s19  }
  0x29   : > { %237 = sbr.rel (%p1180_p3) target bundleno = 756 (0x2f4), region = 32  ;;  %s1199_s30 = sand.u32 (!%p1180_p3), 1, %s1043_s13  }
  0x2a   : > { %s755_s7 = sshll.u32 (!%p1180_p3), %s1199_s30, 5  ;;  %s240_s1 = scalar_lea.sflag (!%p1180_p3), [#allocation7], %s1199_s30 }
  0x2b   : > { %s243_s28 = scalar_lea.vmem (!%p1180_p3), [#allocation6], %s755_s7 }
  0x2e   : > { %1026 = dma.done.wait (%p1139_p8), %s240_s1, 512  }
  0x2f   : > { %1028 = vsyncadd (%p1139_p8), %s240_s1, 4294966784  ;;  %s249_s2 = sand.u32 1, %s1119_s18   ;;  %s756_s14 = sshll.u32 %s1199_s30, 3 }
  0x30   : > { %s250_s20 = scalar_lea.sflag [#allocation10], %s249_s2  ;;  %s253_s26 = scalar_lea.vmem [#allocation9], %s756_s14 }
  0x31   : > { %1030 = dma.done.wait (%p1139_p8), %s250_s20, 256  }
  0x32   : > { %1032 = vsyncadd (%p1139_p8), %s250_s20, 4294967040  ;;  %vm312_vm0 = vcmask 261120   ;;  %v329_v0 = vld [vmem:[%s253_s26] sm:$0xff]  ;;  %v319_v2 = vld [vmem:[%s243_s28 + $0x10] sm:$0xff]  ;;  %vm303_vm1 = vcmask 7168   ;;  %v1063_v13 = vmov -inf  }
  0x33   : > { %v317_v1 = vld [vmem:[%s243_s28] sm:$0xff]  ;;  %759 = vmatpush.xpose.msk.msra.mxu0 %vm312_vm0, %v329_v0  ;;  %775 = vmatpush.xpose.msk.msra.mxu2 %vm312_vm0, %v329_v0  ;;  %v323_v4 = vmul.f32 0.25503486, %v319_v2  ;;  %v318_v5 = vld [vmem:[%s243_s28 + $0x8] sm:$0xff]  ;;  %v320_v6 = vld [vmem:[%s243_s28 + $0x18] sm:$0xff]  ;;  %305 = vst.msk [vmem:[#allocation2 + $0x8] sm:$0xff] %vm303_vm1, %v1063_v13 }
  0x34   : > { %v321_v3 = vmul.f32 0.25503486, %v317_v1  ;;  %v322_v7 = vmul.f32 0.25503486, %v318_v5  ;;  %v324_v8 = vmul.f32 0.25503486, %v320_v6 }
  0x35   : > { %327 = vst.msk [vmem:[#allocation5 + $0x10] sm:$0xff] %vm312_vm0, %v323_v4  ;;  %vm383_vm2 = vcmask 64512   ;;  %v1064_v22 = vmov 0   ;;  %v1065_v23 = vmov 0.0   ;;  %s263_s18 = scalar_lea.vmem [#allocation11], %s756_s14  ;;  %s296_s24 = scalar_lea.vmem [#allocation12], %s755_s7 }
  0x36   : > { %325 = vst.msk [vmem:[#allocation5] sm:$0xff] %vm312_vm0, %v321_v3  ;;  %856 = vset.pattern.permute.xlu2 %v1064_v22  ;;  %857 = vset.pattern.permute.xlu0 %v1064_v22  ;;  %v465_v40 = vld [vmem:[%s263_s18] sm:$0xff]  ;;  %s774_s4 = sshll.u32 %s1051_s15, 5  ;;  %s605_s8 = sshll.u32 %s296_s24, 4  ;;  %s606_s8 = int_to_ptr.vmem [resolvable:$true] %s605_s8 }
  0x37   : > { %326 = vst.msk [vmem:[#allocation5 + $0x8] sm:$0xff] %vm312_vm0, %v322_v7  ;;  %858 = vset.pattern.permute.xlu1 %v1064_v22  ;;  %776 = vmatpush.msra.mxu3 %v465_v40  ;;  %s604_s6 = scalar_lea.hbm %s1332_s3, %s774_s4  ;;  %s591_s29 = scalar_lea.sflag [#allocation8], %s1199_s30 }
  0x38   : > { %328 = vst.msk [vmem:[#allocation5 + $0x18] sm:$0xff] %vm312_vm0, %v324_v8  ;;  %521 = vmatpush.msra.mxu1 %v465_v40  ;;  %s607_s10 = sshll.u32 %s604_s6, 4  ;;  %s993_s21 = scalar_lea.hbm %s1332_s3, 64  ;;  %s608_s10 = int_to_ptr.hbm [resolvable:$true] %s607_s10 }
  0x39   : > { %304 = vst.msk [vmem:[#allocation2] sm:$0xff] %vm303_vm1, %v1063_v13  ;;  %s987_s9 = sshra.s32 %s608_s10, 4  ;;  %s988_s9 = int_to_ptr.hbm [resolvable:$true] %s987_s9 }
  0x3a   : > { %306 = vst.msk [vmem:[#allocation2 + $0x10] sm:$0xff] %vm303_vm1, %v1063_v13  ;;  %v380_v24 = vld [vmem:[#allocation2 + $0x8] sm:$0xff]  ;;  %s989_s11 = scalar_lea.hbm %s988_s9, 32  ;;  %p994_p7 = scmp.lt.s32.totalorder %s988_s9, %s1332_s3 }
  0x3b   : > { %307 = vst.msk [vmem:[#allocation2 + $0x18] sm:$0xff] %vm303_vm1, %v1063_v13  ;;  %p990_p4 = scmp.ne.s32.totalorder %s988_s9, %s989_s11  ;;  %p995_p8 = scmp.lt.s32.totalorder %s993_s21, %s989_s11 }
  0x3c   : > { %v332_v10 = vld [vmem:[#allocation5 + $0x10] sm:$0xff]  ;;  %309 = vst.msk [vmem:[#allocation3 + $0x8] sm:$0xff] %vm303_vm1, %v1065_v23 }
  0x3d   : > { %v330_v9 = vld [vmem:[#allocation5] sm:$0xff]  ;;  %762 = vmatmul.msk.f32.vlgmr.msra.gmra.mxu2 %vm312_vm0, %v332_v10  ;;  %308 = vst.msk [vmem:[#allocation3] sm:$0xff] %vm303_vm1, %v1065_v23  ;;  %p991_p5 = pnand %p990_p4, %p1143_p9  ;;  %p996_p10 = por %p995_p8, %p994_p7 }
  0x3e   : > { %760 = vmatmul.msk.f32.vlgmr.msra.gmra.mxu0 %vm312_vm0, %v330_v9  ;;  %v331_v11 = vld [vmem:[#allocation5 + $0x8] sm:$0xff]  ;;  %310 = vst.msk [vmem:[#allocation3 + $0x10] sm:$0xff] %vm303_vm1, %v1065_v23 }
  0x3f   : > { %v333_v12 = vld [vmem:[#allocation5 + $0x18] sm:$0xff]  ;;  %311 = vst.msk [vmem:[#allocation3 + $0x18] sm:$0xff] %vm303_vm1, %v1065_v23  ;;  %p992_p6 = pneg %p991_p5 }
  0x40   : > { %313 = vst.msk [vmem:[#allocation4] sm:$0xff] %vm312_vm0, %v1065_v23  ;;  %v379_v36 = vld [vmem:[#allocation2] sm:$0xff] }
  0x41   : > { %314 = vst.msk [vmem:[#allocation4 + $0x8] sm:$0xff] %vm312_vm0, %v1065_v23  ;;  %v381_v29 = vld [vmem:[#allocation2 + $0x10] sm:$0xff]  ;;  %p997_p13 = pnand %p996_p10, %p992_p6 }
  0x42   : > { %315 = vst.msk [vmem:[#allocation4 + $0x10] sm:$0xff] %vm312_vm0, %v1065_v23  ;;  %v1250_v28 = vld [vmem:[#allocation2 + $0x18] sm:$0xff] }
  0x43   : > { %316 = vst.msk [vmem:[#allocation4 + $0x18] sm:$0xff] %vm312_vm0, %v1065_v23  ;;  %v437_v60 = vld [vmem:[#allocation3 + $0x8] sm:$0xff] }
  0x45   : > { %763 = vmatmul.msk.f32.gmra.mxu2 %vm312_vm0, %v333_v12  ;;  %v438_v0 = vld [vmem:[#allocation3 + $0x10] sm:$0xff] }
  0x46   : > { %761 = vmatmul.msk.f32.gmra.mxu0 %vm312_vm0, %v331_v11 }
  0x48   : > { %v467_v7 = vld [vmem:[#allocation4 + $0x8] sm:$0xff] }
  0xbb   : > { %v1231_v14 = vpop.f32.mrf.mxu0 }
  0xbc   : > { %v384_v21 = vsel %vm383_vm2, %v1231_v14, -inf }
  0xc0   : > { %v373_v15 = vpop.f32.mrf.mxu2 }
  0xc1   : > { %v390_v20 = vsel %vm383_vm2, %v373_v15, -inf }
  0xc3   : > { %v370_v16 = vpop.f32.mrf.mxu0 }
  0xc4   : > { %v387_v17 = vsel %vm383_vm2, %v370_v16, -inf }
  0xc5   : > { %388 = vmax.xlane.f32.xlu0 %v387_v17 }
  0xc8   : > { %v1234_v18 = vpop.f32.mrf.mxu2 }
  0xc9   : > { %v393_v19 = vsel %vm383_vm2, %v1234_v18, -inf }
  0xca   : > { %394 = vmax.xlane.f32.xlu1 %v393_v19 }
  0xcd   : > { %391 = vmax.xlane.f32.xlu0 %v390_v20 }
  0xd2   : > { %385 = vmax.xlane.f32.xlu1 %v384_v21 }
 0x138   : > { %v389_v25 = vpop.xlane.xlu0 %388 }
 0x139   : > { %v397_v26 = vmax.f32 %v380_v24, %v389_v25 }
 0x13b   : > { %v401_v27 = vsub.f32 %v380_v24, %v397_v26  ;;  %544 = vst.msk [vmem:[#allocation2 + $0x8] sm:$0xff] %vm303_vm1, %v397_v26  ;;  %415 = vperm.xlu2 %856, %v397_v26   ;;  %v468_v24 = vld [vmem:[#allocation4 + $0x10] sm:$0xff] }
 0x13d   : > { %v395_v30 = vpop.xlane.xlu1 %394 }
 0x13e   : > { %v1253_v31 = vmax.f32 %v1250_v28, %v395_v30  ;;  %v439_v30 = vld [vmem:[#allocation3 + $0x18] sm:$0xff] }
 0x140   : > { %v392_v32 = vpop.xlane.xlu0 %391  ;;  %v403_v34 = vsub.f32 %v1250_v28, %v1253_v31  ;;  %546 = vst.msk [vmem:[#allocation2 + $0x18] sm:$0xff] %vm303_vm1, %v1253_v31  ;;  %425 = vperm.xlu0 %857, %v1253_v31  }
 0x141   : > { %v398_v33 = vmax.f32 %v381_v29, %v392_v32 }
 0x143   : > { %v402_v35 = vsub.f32 %v381_v29, %v398_v33  ;;  %545 = vst.msk [vmem:[#allocation2 + $0x10] sm:$0xff] %vm303_vm1, %v398_v33  ;;  %420 = vperm.xlu2 %856, %v398_v33  }
 0x145   : > { %v386_v37 = vpop.xlane.xlu1 %385 }
 0x146   : > { %v396_v38 = vmax.f32 %v379_v36, %v386_v37 }
 0x148   : > { %v400_v39 = vsub.f32 %v379_v36, %v396_v38  ;;  %543 = vst.msk [vmem:[#allocation2] sm:$0xff] %vm303_vm1, %v396_v38  ;;  %410 = vperm.xlu1 %858, %v396_v38  }
 0x195   : > { %v416_v41 = vpop.permute.xlu2 %415 }
 0x196   : > { %v429_v42 = vsub.f32 %v370_v16, %v416_v41 }
 0x198   : > { %859 = vpow2.f32 %v429_v42 }
 0x19d   : > { %v421_v43 = vpop.permute.xlu2 %420 }
 0x19e   : > { %v860_v44 = vpop.eup %859  ;;  %v430_v45 = vsub.f32 %v373_v15, %v421_v43 }
 0x19f   : > { %765 = vmatmul.msk.f32.vlgmr.msra.gmra.mxu3 %vm383_vm2, %v860_v44  ;;  %v447_v46 = vsel %vm383_vm2, %v860_v44, 0.0 }
 0x1a0   : > { %861 = vpow2.f32 %v430_v45  ;;  %448 = vadd.xlane.f32.xlu1 %v447_v46 }
 0x1a1   : > { %863 = vpow2.f32 %v401_v27 }
 0x1a6   : > { %v862_v47 = vpop.eup %861 }
 0x1a7   : > { %766 = vmatmul.msk.f32.gmra.mxu3 %vm383_vm2, %v862_v47  ;;  %v450_v48 = vsel %vm383_vm2, %v862_v47, 0.0  ;;  %v864_v51 = vpop.eup %863 }
 0x1a8   : > { %451 = vadd.xlane.f32.xlu0 %v450_v48  ;;  %v441_v61 = vmul.f32 %v864_v51, %v437_v60 }
 0x1b2   : > { %v426_v49 = vpop.permute.xlu0 %425 }
 0x1b3   : > { %v431_v50 = vsub.f32 %v1234_v18, %v426_v49  ;;  %v466_v18 = vld [vmem:[#allocation4] sm:$0xff] }
 0x1b5   : > { %865 = vpow2.f32 %v431_v50 }
 0x1b9   : > { %477 = vperm.xlu1 %858, %v864_v51  }
 0x1ba   : > { %v411_v52 = vpop.permute.xlu1 %410 }
 0x1bb   : > { %v866_v53 = vpop.eup %865  ;;  %v428_v54 = vsub.f32 %v1231_v14, %v411_v52  ;;  %v436_v14 = vld [vmem:[#allocation3] sm:$0xff] }
 0x1bc   : > { %767 = vmatmul.msk.f32.gmra.mxu3 %vm383_vm2, %v866_v53  ;;  %v453_v59 = vsel %vm383_vm2, %v866_v53, 0.0 }
 0x1bd   : > { %867 = vpow2.f32 %v428_v54 }
 0x1be   : > { %869 = vpow2.f32 %v400_v39 }
 0x1bf   : > { %871 = vpow2.f32 %v402_v35 }
 0x1c0   : > { %873 = vpow2.f32 %v403_v34  ;;  %v469_v34 = vld [vmem:[#allocation4 + $0x18] sm:$0xff] }
 0x1c3   : > { %v868_v55 = vpop.eup %867 }
 0x1c4   : > { %764 = vmatmul.msk.f32.vlgmr.msra.gmra.mxu1 %vm383_vm2, %v868_v55  ;;  %v444_v56 = vsel %vm383_vm2, %v868_v55, 0.0  ;;  %v870_v57 = vpop.eup %869 }
 0x1c5   : > { %445 = vadd.xlane.f32.xlu2 %v444_v56  ;;  %v872_v58 = vpop.eup %871  ;;  %v440_v15 = vmul.f32 %v870_v57, %v436_v14 }
 0x1c6   : > { %v442_v1 = vmul.f32 %v872_v58, %v438_v0  ;;  %v874_v6 = vpop.eup %873 }
 0x1c7   : > { %v443_v31 = vmul.f32 %v874_v6, %v439_v30 }
 0x1dd   : > { %472 = vperm.xlu2 %856, %v870_v57  }
 0x1e5   : > { %482 = vperm.xlu2 %856, %v872_v58  }
 0x20e   : > { %454 = vadd.xlane.f32.xlu2 %v453_v59 }
 0x213   : > { %v449_v62 = vpop.xlane.xlu1 %448 }
 0x214   : > { %v457_v63 = vadd.f32 %v449_v62, %v441_v61 }
 0x216   : > { %462 = vst.msk [vmem:[#allocation3 + $0x8] sm:$0xff] %vm303_vm1, %v457_v63 }
 0x21b   : > { %v452_v2 = vpop.xlane.xlu0 %451 }
 0x21c   : > { %v458_v3 = vadd.f32 %v452_v2, %v442_v1 }
 0x21d   : > { %v551_v5 = vld [vmem:[#allocation3 + $0x8] sm:$0xff] }
 0x21e   : > { %463 = vst.msk [vmem:[#allocation3 + $0x10] sm:$0xff] %vm303_vm1, %v458_v3 }
 0x222   : > { %v526_v11 = vpop.f32.mrf.mxu3 }
 0x225   : > { %v552_v4 = vld [vmem:[#allocation3 + $0x10] sm:$0xff] }
 0x226   : > { %875 = vrcp.f32 %v552_v4  ;;  %487 = vperm.xlu2 %856, %v874_v6  }
 0x227   : > { %877 = vrcp.f32 %v551_v5 }
 0x22a   : > { %v529_v28 = vpop.f32.mrf.mxu3 }
 0x22b   : > { %v478_v8 = vpop.permute.xlu1 %477 }
 0x22c   : > { %v876_v9 = vpop.eup %875  ;;  %v491_v10 = vmul.f32 %v478_v8, %v467_v7 }
 0x22d   : > { %574 = vperm.xlu1 %858, %v876_v9   ;;  %v878_v13 = vpop.eup %877 }
 0x22e   : > { %v536_v12 = vadd.f32 %v526_v11, %v491_v10  ;;  %569 = vperm.xlu2 %856, %v878_v13  }
 0x230   : > { %540 = vst.msk [vmem:[#allocation4 + $0x8] sm:$0xff] %vm312_vm0, %v536_v12 }
 0x237   : > { %v559_v40 = vld [vmem:[#allocation4 + $0x8] sm:$0xff] }
 0x238   : > { %v446_v16 = vpop.xlane.xlu2 %445 }
 0x239   : > { %v456_v17 = vadd.f32 %v446_v16, %v440_v15 }
 0x23b   : > { %461 = vst.msk [vmem:[#allocation3] sm:$0xff] %vm303_vm1, %v456_v17 }
 0x23f   : > { %v532_v37 = vpop.f32.mrf.mxu3 }
 0x240   : > { %v473_v19 = vpop.permute.xlu2 %472 }
 0x241   : > { %v490_v20 = vmul.f32 %v473_v19, %v466_v18  ;;  %v523_v21 = vpop.f32.mrf.mxu1 }
 0x242   : > { %v550_v22 = vld [vmem:[#allocation3] sm:$0xff] }
 0x243   : > { %v535_v23 = vadd.f32 %v523_v21, %v490_v20  ;;  %879 = vrcp.f32 %v550_v22 }
 0x245   : > { %539 = vst.msk [vmem:[#allocation4] sm:$0xff] %vm312_vm0, %v535_v23 }
 0x248   : > { %v483_v25 = vpop.permute.xlu2 %482 }
 0x249   : > { %v880_v26 = vpop.eup %879  ;;  %v492_v27 = vmul.f32 %v483_v25, %v468_v24 }
 0x24a   : > { %564 = vperm.xlu0 %857, %v880_v26  }
 0x24b   : > { %v537_v29 = vadd.f32 %v529_v28, %v492_v27 }
 0x24c   : > { %v558_v47 = vld [vmem:[#allocation4] sm:$0xff] }
 0x24d   : > { %541 = vst.msk [vmem:[#allocation4 + $0x10] sm:$0xff] %vm312_vm0, %v537_v29 }
 0x254   : > { %v560_v45 = vld [vmem:[#allocation4 + $0x10] sm:$0xff] }
 0x281   : > { %v455_v32 = vpop.xlane.xlu2 %454 }
 0x282   : > { %v459_v33 = vadd.f32 %v455_v32, %v443_v31 }
 0x284   : > { %464 = vst.msk [vmem:[#allocation3 + $0x18] sm:$0xff] %vm303_vm1, %v459_v33 }
 0x289   : > { %v488_v35 = vpop.permute.xlu2 %487 }
 0x28a   : > { %v493_v36 = vmul.f32 %v488_v35, %v469_v34 }
 0x28b   : > { %v553_v38 = vld [vmem:[#allocation3 + $0x18] sm:$0xff] }
 0x28c   : > { %v538_v39 = vadd.f32 %v532_v37, %v493_v36  ;;  %881 = vrcp.f32 %v553_v38 }
 0x28e   : > { %542 = vst.msk [vmem:[#allocation4 + $0x18] sm:$0xff] %vm312_vm0, %v538_v39 }
 0x291   : > { %v570_v41 = vpop.permute.xlu2 %569 }
 0x292   : > { %v882_v42 = vpop.eup %881  ;;  %v583_v43 = vmul.f32 %v570_v41, %v559_v40 }
 0x293   : > { %579 = vperm.xlu2 %856, %v882_v42  }
 0x294   : > { %587 = vst.msk [vmem:[%s296_s24 + $0x8] sm:$0xff] %vm312_vm0, %v583_v43 }
 0x295   : > { %v561_v50 = vld [vmem:[#allocation4 + $0x18] sm:$0xff] }
 0x29f   : > { %v575_v44 = vpop.permute.xlu1 %574 }
 0x2a0   : > { %v584_v46 = vmul.f32 %v575_v44, %v560_v45 }
 0x2a2   : > { %588 = vst.msk [vmem:[%s296_s24 + $0x10] sm:$0xff] %vm312_vm0, %v584_v46 }
 0x2bc   : > { %v565_v48 = vpop.permute.xlu0 %564 }
 0x2bd   : > { %v582_v49 = vmul.f32 %v565_v48, %v558_v47 }
 0x2bf   : > { %586 = vst.msk [vmem:[%s296_s24] sm:$0xff] %vm312_vm0, %v582_v49 }
 0x2ed   : > { %v580_v51 = vpop.permute.xlu2 %579 }
 0x2ee   : > { %v585_v52 = vmul.f32 %v580_v51, %v561_v50 }
 0x2f0   : > { %589 = vst.msk [vmem:[%s296_s24 + $0x18] sm:$0xff] %vm312_vm0, %v585_v52 }
 0x2f1   : > { %1000 = shalt.err (!%p997_p13)
}
 0x2f2   : > { %s1066_s30 = smov 128   ;;  %s1067_s1 = smov 8  }
 0x2f3   : > { %783 = dma.vmem_to_hbm [thread:$0]  (%p1143_p9), %s606_s8, 512, %s608_s10, %s591_s29, %s1066_s30, %s1066_s30, %s1067_s1  }
 0x2f4 PF: > { %s622_s28 = sand.u32 1, %s1039_s12   ;;  %p796_p0 = pnand %p746_p12, %p1150_p11 }
 0x2f5   : > { %s623_s2 = scalar_lea.sflag [#allocation8], %s622_s28 }
 0x2f6   : > { %p797_p1 = pneg %p796_p0 }
 0x2f8   : > { %1034 = dma.done.wait (%p797_p1), %s623_s2, 512  }
 0x2f9   : > { %1036 = vsyncadd (%p797_p1), %s623_s2, 4294966784  ;;  %s22_s17 = sadd.s32 1, %s1059_s17   ;;  %s1350_s14 = sld [smem:[#allocation16_spill]] }
 0x2fa   : > { %p19_p2 = scmp.ge.s32.totalorder %s22_s17, 4   ;;  %s1351_s20 = sld [smem:[#allocation18_spill]] }
 0x2fb   : > { %s1352_s25 = sld [smem:[#allocation17_spill]]  ;;  %s1353_s12 = smov %s1043_s13 }
 0x2fc   : > { %s1356_s15 = smov %s1055_s16 }
 0x2fd   :  { %21 = sbr.rel (!%p19_p2) target bundleno = 11 (0xb), region = 109 }
 0x2ff   : > { %s1354_s13 = smov %s1350_s14 }
 0x300   : > { %s1355_s14 = smov %s1351_s20 }
 0x301   : > { %s1357_s16 = smov %s1352_s25 }
 0x302   :  { %629 = vsyncpa [#allocation7], 1 }
 0x303   :  { %631 = vsyncpa [#allocation7 + $0x1], 1 }
 0x304   :  { %632 = vsyncpa [#allocation10], 1 }
 0x305   :  { %634 = vsyncpa [#allocation10 + $0x1], 1 }
 0x306   :  { %635 = vsyncpa [#allocation8], 1 }
 0x307   :  { %637 = vsyncpa [#allocation8 + $0x1], 1 }

// kernel: tpu_custom_call.1
= control target key start
LH: loop header
LB: loop body
LE: loop exit
PB: predicated region body
PF: predicated region fallthrough
CT: control target
= control target key end

     0   :  { %s1337_s0 = inlined_call_operand.hbm [shape: f32[2,32,32], index: 0, kind: input, shape index: {}]   ;;  %s1338_s1 = inlined_call_operand.hbm [shape: f32[2,8,32], index: 1, kind: input, shape index: {}]   ;;  %s1339_s2 = inlined_call_operand.hbm [shape: f32[2,8,32], index: 2, kind: input, shape index: {}]   ;;  %s1340_s3 = inlined_call_operand.hbm [shape: f32[2,32,32], index: 3, kind: output, shape index: {}]  }
   0x1   :  { %1344 = sst [smem:[#allocation19_spill]] %s1338_s1 }
   0x2   :  { %1345 = sst [smem:[#allocation20_spill]] %s1339_s2 }
   0x3   :  { %8 = vsyncpa [#allocation7], 0 }
   0x4   :  { %10 = vsyncpa [#allocation7 + $0x1], 0 }
   0x5   :  { %11 = vsyncpa [#allocation10], 0 }
   0x6   :  { %13 = vsyncpa [#allocation10 + $0x1], 0 }
   0x7   :  { %14 = vsyncpa [#allocation8], 0 }
   0x8   :  { %16 = vsyncpa [#allocation8 + $0x1], 0  ;;  %s1096_s12 = smov 0   ;;  %s1098_s13 = smov 0  }
   0x9   :  { %s1100_s14 = smov 0   ;;  %s1102_s15 = smov 0  }
   0xa   :  { %s1104_s16 = smov 0   ;;  %s1106_s17 = smov 0  }
   0xb LB: > { %1346 = sst [smem:[#allocation16_spill]] %s1055_s14  ;;  %s1127_s18 = sadd.s32 4294967295, %s1067_s17   ;;  %s1067_s17 = sphi %s1106_s17, %s22_s17   ;;  %s1063_s16 = sphi %s1104_s16, %s1365_s16   ;;  %s1059_s15 = sphi %s1102_s15, %s1364_s15   ;;  %s1055_s14 = sphi %s1100_s14, %s1363_s14   ;;  %s1051_s13 = sphi %s1098_s13, %s1362_s13   ;;  %s1047_s12 = sphi %s1096_s12, %s1361_s12  }
   0xc   : > { %s752_s19 = sadd.s32 4294967294, %s1067_s17   ;;  %s41_s20 = sadd.s32 1, %s1063_s16 }
   0xd   : > { %s50_s21 = sadd.s32 1, %s1055_s14  ;;  %p43_p0 = scmp.ge.s32.totalorder %s41_s20, 2 }
   0xe   : > { %p57_p1 = scmp.ne.s32.totalorder %s1055_s14, %s1051_s13  ;;  %p58_p2 = scmp.eq.s32.totalorder %s1067_s17, 0 }
   0xf   : > { %p63_p3 = scmp.ne.s32.totalorder %s1051_s13, %s1047_s12  ;;  %s1367_s20 = smov (%p43_p0, %s41_s20), 0 }
  0x10   : > { %1347 = sst [smem:[#allocation17_spill]] %s1367_s20  ;;  %p1139_p4 = por %p58_p2, %p57_p1 }
  0x11   : > { %p64_p5 = scmp.eq.s32.totalorder %s1127_s18, 0  ;;  %s45_s23 = ssub.s32 %s1063_s16, %s1367_s20 }
  0x12   : > { %p145_p6 = scmp.eq.s32.totalorder %s1127_s18, 1  ;;  %p48_p7 = scmp.eq.s32.totalorder %s45_s23, 0 }
  0x13   : > { %p1147_p8 = por %p64_p5, %p63_p3  ;;  %p151_p10 = scmp.eq.s32.totalorder %s752_s19, 1 }
  0x14   : > { %p1151_p9 = por %p145_p6, %p57_p1  ;;  %p754_p12 = scmp.ge.s32.totalorder %s1067_s17, 2 }
  0x15   : > { %s1156_s26 = scalar_select %p48_p7, %s1055_s14, %s50_s21  }
  0x16   : > { %p1158_p11 = por %p151_p10, %p63_p3  ;;  %p807_p13 = scmp.lt.s32.totalorder %s1067_s17, 2 }
  0x17   : > { %1351 = sst [smem:[#allocation18_spill]] %s1156_s26  ;;  %s1165_s28 = sand.u32 1, %s1055_s14  }
  0x18   : > { %s195_s29 = sand.u32 1, %s1067_s17   ;;  %s1341_s30 = sshll.u32 %s1165_s28, 3 }
  0x19   : > { %p1171_p0 = pnand %p807_p13, %p1139_p4  ;;  %s759_s5 = sshll.u32 %s1063_s16, 3 }
  0x1a   : > { %s1354_s1 = sld [smem:[#allocation19_spill]]  ;;  %s199_s10 = scalar_lea.vmem [#allocation9], %s1341_s30 }
  0x1b   : > { %s208_s11 = sshll.u32 %s199_s10, 4  ;;  %s196_s19 = scalar_lea.sflag [#allocation10], %s195_s29  ;;  %s209_s11 = int_to_ptr.vmem [resolvable:$true] %s208_s11 }
  0x1c   : > { %s1355_s2 = sld [smem:[#allocation20_spill]]  ;;  %p762_p1 = scmp.ge.s32.totalorder %s1067_s17, 1 }
  0x1d   : > { %p233_p2 = scmp.lt.s32.totalorder %s1067_s17, 3  ;;  %s755_s7 = sshll.u32 %s1165_s28, 5 }
  0x1e   : > { %s1069_s21 = smov 128   ;;  %s1070_s22 = smov 8  }
  0x1f   : > { %p1188_p3 = pnand %p762_p1, %p233_p2  ;;  %s1357_s20 = sshll.u32 %s1165_s28, 3 }
  0x20   : > { %s204_s8 = scalar_lea.hbm %s1354_s1, %s759_s5  ;;  %s219_s26 = scalar_lea.vmem [#allocation11], %s1357_s20 }
  0x21   : > { %s206_s9 = sshll.u32 %s204_s8, 4  ;;  %s781_s8 = sshll.u32 %s1063_s16, 5  ;;  %s207_s9 = int_to_ptr.hbm [resolvable:$true] %s206_s9 }
  0x22   : > { %799 = dma.hbm_to_vmem [thread:$0]  (!%p1171_p0), %s207_s9, 128, %s209_s11, %s196_s19  }
  0x23   : > { %s224_s23 = scalar_lea.hbm %s1355_s2, %s759_s5  ;;  %s182_s29 = scalar_lea.hbm %s1337_s0, %s781_s8 }
  0x24   : > { %s183_s9 = sshll.u32 %s182_s29, 4  ;;  %s175_s11 = scalar_lea.vmem [#allocation6], %s755_s7  ;;  %s184_s9 = int_to_ptr.hbm [resolvable:$true] %s183_s9 }
  0x25   : > { %s185_s1 = sshll.u32 %s175_s11, 4  ;;  %s172_s5 = scalar_lea.sflag [#allocation7], %s1165_s28  ;;  %s186_s1 = int_to_ptr.vmem [resolvable:$true] %s185_s1 }
  0x26   : > { %796 = dma.hbm_to_vmem [thread:$0]  (!%p1171_p0), %s184_s9, 512, %s186_s1, %s172_s5, %s1069_s21, %s1069_s21, %s1070_s22  }
  0x27   : > { %s226_s2 = sshll.u32 %s224_s23, 4  ;;  %s228_s14 = sshll.u32 %s219_s26, 4  ;;  %s227_s2 = int_to_ptr.hbm [resolvable:$true] %s226_s2  ;;  %s229_s14 = int_to_ptr.vmem [resolvable:$true] %s228_s14 }
  0x28   : > { %802 = dma.hbm_to_vmem [thread:$0]  (!%p1171_p0), %s227_s2, 128, %s229_s14, %s196_s19  }
  0x29   : > { %237 = sbr.rel (%p1188_p3) target bundleno = 758 (0x2f6), region = 32  ;;  %s1207_s30 = sand.u32 (!%p1188_p3), 1, %s1051_s13  }
  0x2a   : > { %s763_s7 = sshll.u32 (!%p1188_p3), %s1207_s30, 5  ;;  %s240_s1 = scalar_lea.sflag (!%p1188_p3), [#allocation7], %s1207_s30 }
  0x2b   : > { %s243_s28 = scalar_lea.vmem (!%p1188_p3), [#allocation6], %s763_s7 }
  0x2e   : > { %1034 = dma.done.wait (%p1147_p8), %s240_s1, 512  }
  0x2f   : > { %1036 = vsyncadd (%p1147_p8), %s240_s1, 4294966784  ;;  %s249_s2 = sand.u32 1, %s1127_s18   ;;  %s764_s14 = sshll.u32 %s1207_s30, 3 }
  0x30   : > { %s250_s20 = scalar_lea.sflag [#allocation10], %s249_s2  ;;  %s253_s26 = scalar_lea.vmem [#allocation9], %s764_s14 }
  0x31   : > { %1038 = dma.done.wait (%p1147_p8), %s250_s20, 256  }
  0x32   : > { %1040 = vsyncadd (%p1147_p8), %s250_s20, 4294967040  ;;  %vm312_vm0 = vcmask 261120   ;;  %v329_v0 = vld [vmem:[%s253_s26] sm:$0xff]  ;;  %v319_v2 = vld [vmem:[%s243_s28 + $0x10] sm:$0xff]  ;;  %vm303_vm1 = vcmask 7168   ;;  %v1071_v13 = vmov -inf  }
  0x33   : > { %v317_v1 = vld [vmem:[%s243_s28] sm:$0xff]  ;;  %767 = vmatpush.xpose.msk.msra.mxu0 %vm312_vm0, %v329_v0  ;;  %783 = vmatpush.xpose.msk.msra.mxu2 %vm312_vm0, %v329_v0  ;;  %v323_v4 = vmul.f32 0.17677669, %v319_v2  ;;  %v318_v5 = vld [vmem:[%s243_s28 + $0x8] sm:$0xff]  ;;  %v320_v6 = vld [vmem:[%s243_s28 + $0x18] sm:$0xff]  ;;  %305 = vst.msk [vmem:[#allocation2 + $0x8] sm:$0xff] %vm303_vm1, %v1071_v13 }
  0x34   : > { %v321_v3 = vmul.f32 0.17677669, %v317_v1  ;;  %v322_v7 = vmul.f32 0.17677669, %v318_v5  ;;  %v324_v8 = vmul.f32 0.17677669, %v320_v6 }
  0x35   : > { %327 = vst.msk [vmem:[#allocation5 + $0x10] sm:$0xff] %vm312_vm0, %v323_v4  ;;  %vm383_vm2 = vcmask 64512   ;;  %v1072_v22 = vmov 0   ;;  %v1073_v23 = vmov 0.0   ;;  %s263_s18 = scalar_lea.vmem [#allocation11], %s764_s14  ;;  %s296_s24 = scalar_lea.vmem [#allocation12], %s763_s7 }
  0x36   : > { %325 = vst.msk [vmem:[#allocation5] sm:$0xff] %vm312_vm0, %v321_v3  ;;  %864 = vset.pattern.permute.xlu2 %v1072_v22  ;;  %865 = vset.pattern.permute.xlu0 %v1072_v22  ;;  %v473_v40 = vld [vmem:[%s263_s18] sm:$0xff]  ;;  %s782_s4 = sshll.u32 %s1059_s15, 5  ;;  %s613_s8 = sshll.u32 %s296_s24, 4  ;;  %s614_s8 = int_to_ptr.vmem [resolvable:$true] %s613_s8 }
  0x37   : > { %326 = vst.msk [vmem:[#allocation5 + $0x8] sm:$0xff] %vm312_vm0, %v322_v7  ;;  %866 = vset.pattern.permute.xlu1 %v1072_v22  ;;  %784 = vmatpush.msra.mxu3 %v473_v40  ;;  %s612_s6 = scalar_lea.hbm %s1340_s3, %s782_s4  ;;  %s599_s29 = scalar_lea.sflag [#allocation8], %s1207_s30 }
  0x38   : > { %328 = vst.msk [vmem:[#allocation5 + $0x18] sm:$0xff] %vm312_vm0, %v324_v8  ;;  %529 = vmatpush.msra.mxu1 %v473_v40  ;;  %s615_s10 = sshll.u32 %s612_s6, 4  ;;  %s1001_s21 = scalar_lea.hbm %s1340_s3, 64  ;;  %s616_s10 = int_to_ptr.hbm [resolvable:$true] %s615_s10 }
  0x39   : > { %304 = vst.msk [vmem:[#allocation2] sm:$0xff] %vm303_vm1, %v1071_v13  ;;  %s995_s9 = sshra.s32 %s616_s10, 4  ;;  %s996_s9 = int_to_ptr.hbm [resolvable:$true] %s995_s9 }
  0x3a   : > { %306 = vst.msk [vmem:[#allocation2 + $0x10] sm:$0xff] %vm303_vm1, %v1071_v13  ;;  %v380_v24 = vld [vmem:[#allocation2 + $0x8] sm:$0xff]  ;;  %s997_s11 = scalar_lea.hbm %s996_s9, 32  ;;  %p1002_p7 = scmp.lt.s32.totalorder %s996_s9, %s1340_s3 }
  0x3b   : > { %307 = vst.msk [vmem:[#allocation2 + $0x18] sm:$0xff] %vm303_vm1, %v1071_v13  ;;  %p998_p4 = scmp.ne.s32.totalorder %s996_s9, %s997_s11  ;;  %p1003_p8 = scmp.lt.s32.totalorder %s1001_s21, %s997_s11 }
  0x3c   : > { %v332_v10 = vld [vmem:[#allocation5 + $0x10] sm:$0xff]  ;;  %309 = vst.msk [vmem:[#allocation3 + $0x8] sm:$0xff] %vm303_vm1, %v1073_v23 }
  0x3d   : > { %v330_v9 = vld [vmem:[#allocation5] sm:$0xff]  ;;  %770 = vmatmul.msk.f32.vlgmr.msra.gmra.mxu2 %vm312_vm0, %v332_v10  ;;  %308 = vst.msk [vmem:[#allocation3] sm:$0xff] %vm303_vm1, %v1073_v23  ;;  %p999_p5 = pnand %p998_p4, %p1151_p9  ;;  %p1004_p10 = por %p1003_p8, %p1002_p7 }
  0x3e   : > { %768 = vmatmul.msk.f32.vlgmr.msra.gmra.mxu0 %vm312_vm0, %v330_v9  ;;  %v331_v11 = vld [vmem:[#allocation5 + $0x8] sm:$0xff]  ;;  %310 = vst.msk [vmem:[#allocation3 + $0x10] sm:$0xff] %vm303_vm1, %v1073_v23 }
  0x3f   : > { %v333_v12 = vld [vmem:[#allocation5 + $0x18] sm:$0xff]  ;;  %311 = vst.msk [vmem:[#allocation3 + $0x18] sm:$0xff] %vm303_vm1, %v1073_v23  ;;  %p1000_p6 = pneg %p999_p5 }
  0x40   : > { %313 = vst.msk [vmem:[#allocation4] sm:$0xff] %vm312_vm0, %v1073_v23  ;;  %v379_v36 = vld [vmem:[#allocation2] sm:$0xff] }
  0x41   : > { %314 = vst.msk [vmem:[#allocation4 + $0x8] sm:$0xff] %vm312_vm0, %v1073_v23  ;;  %v381_v29 = vld [vmem:[#allocation2 + $0x10] sm:$0xff]  ;;  %p1005_p13 = pnand %p1004_p10, %p1000_p6 }
  0x42   : > { %315 = vst.msk [vmem:[#allocation4 + $0x10] sm:$0xff] %vm312_vm0, %v1073_v23  ;;  %v1258_v28 = vld [vmem:[#allocation2 + $0x18] sm:$0xff] }
  0x43   : > { %316 = vst.msk [vmem:[#allocation4 + $0x18] sm:$0xff] %vm312_vm0, %v1073_v23  ;;  %v445_v3 = vld [vmem:[#allocation3 + $0x8] sm:$0xff] }
  0x44   : > { %v444_v22 = vld [vmem:[#allocation3] sm:$0xff] }
  0x45   : > { %771 = vmatmul.msk.f32.gmra.mxu2 %vm312_vm0, %v333_v12  ;;  %v446_v7 = vld [vmem:[#allocation3 + $0x10] sm:$0xff] }
  0x46   : > { %769 = vmatmul.msk.f32.gmra.mxu0 %vm312_vm0, %v331_v11 }
  0xbb   : > { %v1239_v14 = vpop.f32.mrf.mxu0 }
  0xbc   : > { %v384_v21 = vsel %vm383_vm2, %v1239_v14, -inf }
  0xc0   : > { %v373_v15 = vpop.f32.mrf.mxu2 }
  0xc1   : > { %v390_v20 = vsel %vm383_vm2, %v373_v15, -inf }
  0xc3   : > { %v370_v16 = vpop.f32.mrf.mxu0 }
  0xc4   : > { %v387_v17 = vsel %vm383_vm2, %v370_v16, -inf }
  0xc5   : > { %388 = vmax.xlane.f32.xlu0 %v387_v17 }
  0xc8   : > { %v1242_v18 = vpop.f32.mrf.mxu2 }
  0xc9   : > { %v393_v19 = vsel %vm383_vm2, %v1242_v18, -inf }
  0xca   : > { %394 = vmax.xlane.f32.xlu1 %v393_v19 }
  0xcd   : > { %391 = vmax.xlane.f32.xlu0 %v390_v20 }
  0xd2   : > { %385 = vmax.xlane.f32.xlu1 %v384_v21 }
 0x138   : > { %v389_v25 = vpop.xlane.xlu0 %388 }
 0x139   : > { %v397_v26 = vmax.f32 %v380_v24, %v389_v25 }
 0x13b   : > { %v401_v27 = vsub.f32 %v380_v24, %v397_v26  ;;  %552 = vst.msk [vmem:[#allocation2 + $0x8] sm:$0xff] %vm303_vm1, %v397_v26  ;;  %419 = vperm.xlu2 %864, %v397_v26   ;;  %v474_v26 = vld [vmem:[#allocation4] sm:$0xff] }
 0x13d   : > { %v395_v30 = vpop.xlane.xlu1 %394  ;;  %v406_v51 = vmul.f32 1.442695, %v401_v27 }
 0x13e   : > { %v1261_v31 = vmax.f32 %v1258_v28, %v395_v30 }
 0x140   : > { %v392_v32 = vpop.xlane.xlu0 %391  ;;  %v403_v34 = vsub.f32 %v1258_v28, %v1261_v31  ;;  %554 = vst.msk [vmem:[#allocation2 + $0x18] sm:$0xff] %vm303_vm1, %v1261_v31  ;;  %429 = vperm.xlu0 %865, %v1261_v31  }
 0x141   : > { %v398_v33 = vmax.f32 %v381_v29, %v392_v32  ;;  %v476_v32 = vld [vmem:[#allocation4 + $0x10] sm:$0xff] }
 0x142   : > { %v410_v11 = vmul.f32 1.442695, %v403_v34 }
 0x143   : > { %v402_v35 = vsub.f32 %v381_v29, %v398_v33  ;;  %553 = vst.msk [vmem:[#allocation2 + $0x10] sm:$0xff] %vm303_vm1, %v398_v33  ;;  %424 = vperm.xlu2 %864, %v398_v33  }
 0x145   : > { %v386_v37 = vpop.xlane.xlu1 %385  ;;  %v408_v63 = vmul.f32 1.442695, %v402_v35 }
 0x146   : > { %v396_v38 = vmax.f32 %v379_v36, %v386_v37 }
 0x148   : > { %v400_v39 = vsub.f32 %v379_v36, %v396_v38  ;;  %551 = vst.msk [vmem:[#allocation2] sm:$0xff] %vm303_vm1, %v396_v38  ;;  %414 = vperm.xlu1 %866, %v396_v38   ;;  %v447_v38 = vld [vmem:[#allocation3 + $0x18] sm:$0xff] }
 0x14a   : > { %v404_v62 = vmul.f32 1.442695, %v400_v39 }
 0x195   : > { %v420_v41 = vpop.permute.xlu2 %419 }
 0x196   : > { %v433_v42 = vsub.f32 %v370_v16, %v420_v41 }
 0x198   : > { %v438_v43 = vmul.f32 1.442695, %v433_v42  ;;  %v477_v42 = vld [vmem:[#allocation4 + $0x18] sm:$0xff] }
 0x19a   : > { %867 = vpow2.f32 %v438_v43 }
 0x19d   : > { %v425_v44 = vpop.permute.xlu2 %424 }
 0x19e   : > { %v434_v45 = vsub.f32 %v373_v15, %v425_v44  ;;  %v475_v15 = vld [vmem:[#allocation4 + $0x8] sm:$0xff] }
 0x1a0   : > { %v868_v46 = vpop.eup %867  ;;  %v440_v47 = vmul.f32 1.442695, %v434_v45 }
 0x1a1   : > { %773 = vmatmul.msk.f32.vlgmr.msra.gmra.mxu3 %vm383_vm2, %v868_v46  ;;  %v455_v48 = vsel %vm383_vm2, %v868_v46, 0.0 }
 0x1a2   : > { %869 = vpow2.f32 %v440_v47  ;;  %456 = vadd.xlane.f32.xlu1 %v455_v48 }
 0x1a3   : > { %871 = vpow2.f32 %v406_v51 }
 0x1a8   : > { %v870_v49 = vpop.eup %869 }
 0x1a9   : > { %774 = vmatmul.msk.f32.gmra.mxu3 %vm383_vm2, %v870_v49  ;;  %v458_v50 = vsel %vm383_vm2, %v870_v49, 0.0  ;;  %v872_v55 = vpop.eup %871 }
 0x1aa   : > { %459 = vadd.xlane.f32.xlu0 %v458_v50  ;;  %v449_v4 = vmul.f32 %v872_v55, %v445_v3 }
 0x1b2   : > { %v430_v52 = vpop.permute.xlu0 %429 }
 0x1b3   : > { %v435_v53 = vsub.f32 %v1242_v18, %v430_v52 }
 0x1b5   : > { %v442_v54 = vmul.f32 1.442695, %v435_v53 }
 0x1b7   : > { %873 = vpow2.f32 %v442_v54 }
 0x1ba   : > { %v415_v56 = vpop.permute.xlu1 %414 }
 0x1bb   : > { %485 = vperm.xlu1 %866, %v872_v55   ;;  %v432_v57 = vsub.f32 %v1239_v14, %v415_v56 }
 0x1bd   : > { %v874_v58 = vpop.eup %873  ;;  %v436_v59 = vmul.f32 1.442695, %v432_v57 }
 0x1be   : > { %775 = vmatmul.msk.f32.gmra.mxu3 %vm383_vm2, %v874_v58  ;;  %v461_v2 = vsel %vm383_vm2, %v874_v58, 0.0 }
 0x1bf   : > { %875 = vpow2.f32 %v436_v59 }
 0x1c0   : > { %877 = vpow2.f32 %v404_v62 }
 0x1c1   : > { %879 = vpow2.f32 %v408_v63 }
 0x1c2   : > { %881 = vpow2.f32 %v410_v11 }
 0x1c5   : > { %v876_v60 = vpop.eup %875 }
 0x1c6   : > { %772 = vmatmul.msk.f32.vlgmr.msra.gmra.mxu1 %vm383_vm2, %v876_v60  ;;  %v452_v61 = vsel %vm383_vm2, %v876_v60, 0.0  ;;  %v878_v0 = vpop.eup %877 }
 0x1c7   : > { %453 = vadd.xlane.f32.xlu2 %v452_v61  ;;  %v880_v1 = vpop.eup %879  ;;  %v448_v23 = vmul.f32 %v878_v0, %v444_v22 }
 0x1c8   : > { %v450_v8 = vmul.f32 %v880_v1, %v446_v7  ;;  %v882_v14 = vpop.eup %881 }
 0x1c9   : > { %v451_v39 = vmul.f32 %v882_v14, %v447_v38 }
 0x1df   : > { %480 = vperm.xlu2 %864, %v878_v0  }
 0x1e7   : > { %490 = vperm.xlu2 %864, %v880_v1  }
 0x210   : > { %462 = vadd.xlane.f32.xlu2 %v461_v2 }
 0x215   : > { %v457_v5 = vpop.xlane.xlu1 %456 }
 0x216   : > { %v465_v6 = vadd.f32 %v457_v5, %v449_v4 }
 0x218   : > { %470 = vst.msk [vmem:[#allocation3 + $0x8] sm:$0xff] %vm303_vm1, %v465_v6 }
 0x21d   : > { %v460_v9 = vpop.xlane.xlu0 %459 }
 0x21e   : > { %v466_v10 = vadd.f32 %v460_v9, %v450_v8 }
 0x21f   : > { %v559_v13 = vld [vmem:[#allocation3 + $0x8] sm:$0xff] }
 0x220   : > { %471 = vst.msk [vmem:[#allocation3 + $0x10] sm:$0xff] %vm303_vm1, %v466_v10 }
 0x224   : > { %v534_v19 = vpop.f32.mrf.mxu3 }
 0x227   : > { %v560_v12 = vld [vmem:[#allocation3 + $0x10] sm:$0xff] }
 0x228   : > { %883 = vrcp.f32 %v560_v12  ;;  %495 = vperm.xlu2 %864, %v882_v14  }
 0x229   : > { %885 = vrcp.f32 %v559_v13 }
 0x22c   : > { %v537_v36 = vpop.f32.mrf.mxu3 }
 0x22d   : > { %v486_v16 = vpop.permute.xlu1 %485 }
 0x22e   : > { %v884_v17 = vpop.eup %883  ;;  %v499_v18 = vmul.f32 %v486_v16, %v475_v15 }
 0x22f   : > { %582 = vperm.xlu1 %866, %v884_v17   ;;  %v886_v21 = vpop.eup %885 }
 0x230   : > { %v544_v20 = vadd.f32 %v534_v19, %v499_v18  ;;  %577 = vperm.xlu2 %864, %v886_v21  }
 0x232   : > { %548 = vst.msk [vmem:[#allocation4 + $0x8] sm:$0xff] %vm312_vm0, %v544_v20 }
 0x239   : > { %v567_v48 = vld [vmem:[#allocation4 + $0x8] sm:$0xff] }
 0x23a   : > { %v454_v24 = vpop.xlane.xlu2 %453 }
 0x23b   : > { %v464_v25 = vadd.f32 %v454_v24, %v448_v23 }
 0x23d   : > { %469 = vst.msk [vmem:[#allocation3] sm:$0xff] %vm303_vm1, %v464_v25 }
 0x241   : > { %v540_v45 = vpop.f32.mrf.mxu3 }
 0x242   : > { %v481_v27 = vpop.permute.xlu2 %480 }
 0x243   : > { %v498_v28 = vmul.f32 %v481_v27, %v474_v26  ;;  %v531_v29 = vpop.f32.mrf.mxu1 }
 0x244   : > { %v558_v30 = vld [vmem:[#allocation3] sm:$0xff] }
 0x245   : > { %v543_v31 = vadd.f32 %v531_v29, %v498_v28  ;;  %887 = vrcp.f32 %v558_v30 }
 0x247   : > { %547 = vst.msk [vmem:[#allocation4] sm:$0xff] %vm312_vm0, %v543_v31 }
 0x24a   : > { %v491_v33 = vpop.permute.xlu2 %490 }
 0x24b   : > { %v888_v34 = vpop.eup %887  ;;  %v500_v35 = vmul.f32 %v491_v33, %v476_v32 }
 0x24c   : > { %572 = vperm.xlu0 %865, %v888_v34  }
 0x24d   : > { %v545_v37 = vadd.f32 %v537_v36, %v500_v35 }
 0x24e   : > { %v566_v55 = vld [vmem:[#allocation4] sm:$0xff] }
 0x24f   : > { %549 = vst.msk [vmem:[#allocation4 + $0x10] sm:$0xff] %vm312_vm0, %v545_v37 }
 0x256   : > { %v568_v53 = vld [vmem:[#allocation4 + $0x10] sm:$0xff] }
 0x283   : > { %v463_v40 = vpop.xlane.xlu2 %462 }
 0x284   : > { %v467_v41 = vadd.f32 %v463_v40, %v451_v39 }
 0x286   : > { %472 = vst.msk [vmem:[#allocation3 + $0x18] sm:$0xff] %vm303_vm1, %v467_v41 }
 0x28b   : > { %v496_v43 = vpop.permute.xlu2 %495 }
 0x28c   : > { %v501_v44 = vmul.f32 %v496_v43, %v477_v42 }
 0x28d   : > { %v561_v46 = vld [vmem:[#allocation3 + $0x18] sm:$0xff] }
 0x28e   : > { %v546_v47 = vadd.f32 %v540_v45, %v501_v44  ;;  %889 = vrcp.f32 %v561_v46 }
 0x290   : > { %550 = vst.msk [vmem:[#allocation4 + $0x18] sm:$0xff] %vm312_vm0, %v546_v47 }
 0x293   : > { %v578_v49 = vpop.permute.xlu2 %577 }
 0x294   : > { %v890_v50 = vpop.eup %889  ;;  %v591_v51 = vmul.f32 %v578_v49, %v567_v48 }
 0x295   : > { %587 = vperm.xlu2 %864, %v890_v50  }
 0x296   : > { %595 = vst.msk [vmem:[%s296_s24 + $0x8] sm:$0xff] %vm312_vm0, %v591_v51 }
 0x297   : > { %v569_v58 = vld [vmem:[#allocation4 + $0x18] sm:$0xff] }
 0x2a1   : > { %v583_v52 = vpop.permute.xlu1 %582 }
 0x2a2   : > { %v592_v54 = vmul.f32 %v583_v52, %v568_v53 }
 0x2a4   : > { %596 = vst.msk [vmem:[%s296_s24 + $0x10] sm:$0xff] %vm312_vm0, %v592_v54 }
 0x2be   : > { %v573_v56 = vpop.permute.xlu0 %572 }
 0x2bf   : > { %v590_v57 = vmul.f32 %v573_v56, %v566_v55 }
 0x2c1   : > { %594 = vst.msk [vmem:[%s296_s24] sm:$0xff] %vm312_vm0, %v590_v57 }
 0x2ef   : > { %v588_v59 = vpop.permute.xlu2 %587 }
 0x2f0   : > { %v593_v60 = vmul.f32 %v588_v59, %v569_v58 }
 0x2f2   : > { %597 = vst.msk [vmem:[%s296_s24 + $0x18] sm:$0xff] %vm312_vm0, %v593_v60 }
 0x2f3   : > { %1008 = shalt.err (!%p1005_p13)
}
 0x2f4   : > { %s1074_s30 = smov 128   ;;  %s1075_s1 = smov 8  }
 0x2f5   : > { %791 = dma.vmem_to_hbm [thread:$0]  (%p1151_p9), %s614_s8, 512, %s616_s10, %s599_s29, %s1074_s30, %s1074_s30, %s1075_s1  }
 0x2f6 PF: > { %s630_s28 = sand.u32 1, %s1047_s12   ;;  %p804_p0 = pnand %p754_p12, %p1158_p11 }
 0x2f7   : > { %s631_s2 = scalar_lea.sflag [#allocation8], %s630_s28 }
 0x2f8   : > { %p805_p1 = pneg %p804_p0 }
 0x2fa   : > { %1042 = dma.done.wait (%p805_p1), %s631_s2, 512  }
 0x2fb   : > { %1044 = vsyncadd (%p805_p1), %s631_s2, 4294966784  ;;  %s22_s17 = sadd.s32 1, %s1067_s17   ;;  %s1358_s14 = sld [smem:[#allocation16_spill]] }
 0x2fc   : > { %p19_p2 = scmp.ge.s32.totalorder %s22_s17, 4   ;;  %s1359_s20 = sld [smem:[#allocation18_spill]] }
 0x2fd   : > { %s1360_s25 = sld [smem:[#allocation17_spill]]  ;;  %s1361_s12 = smov %s1051_s13 }
 0x2fe   : > { %s1364_s15 = smov %s1063_s16 }
 0x2ff   :  { %21 = sbr.rel (!%p19_p2) target bundleno = 11 (0xb), region = 109 }
 0x301   : > { %s1362_s13 = smov %s1358_s14 }
 0x302   : > { %s1363_s14 = smov %s1359_s20 }
 0x303   : > { %s1365_s16 = smov %s1360_s25 }
 0x304   :  { %637 = vsyncpa [#allocation7], 1 }
 0x305   :  { %639 = vsyncpa [#allocation7 + $0x1], 1 }
 0x306   :  { %640 = vsyncpa [#allocation10], 1 }
 0x307   :  { %642 = vsyncpa [#allocation10 + $0x1], 1 }
 0x308   :  { %643 = vsyncpa [#allocation8], 1 }
 0x309   :  { %645 = vsyncpa [#allocation8 + $0x1], 1 }

</bundles_post_ra>
